<compile_context>
chip_gen: v6e
topology: v6e:2x2x1
jax: 0.10.0
libtpu: 0.0.40
codegen_flags: <defaults>
</compile_context>

<pallas_src>
import functools

import jax
import jax.numpy as jnp
import numpy as np
from jax.experimental import pallas as pl
from jax.experimental.pallas import tpu as pltpu

KSIZE = 7  # Conv1d kernel size (static)


def _round_up(x, m):
    return ((x + m - 1) // m) * m


def _fused_kernel(ids_ref, w_ref, cb_ref, lw_ref, lb_ref, o_ref, oh_ref, *,
                  embed, seq_len, l_out, vocab_pad):
    """One batch tile: embedding + view + Conv1d + ReLU + global max pool + Linear + Sigmoid.

    ids_ref: (L, B_TILE)          int32  token ids, batch along lanes
    w_ref  : (l_out*E, L*Vp)      bf16   folded (embedding ∘ view ∘ conv) weight, resident
    cb_ref : (E, 1)               f32    conv bias
    lw_ref : (E, 1)               f32    linear weight (as a column)
    lb_ref : (1, 1)               f32    linear bias
    o_ref  : (1, B_TILE)          f32    sigmoid output (lane-dense)
    oh_ref : (L*Vp, B_TILE)       bf16   scratch: one-hot token slab
    """
    E, L, Vp = embed, seq_len, vocab_pad
    b_tile = ids_ref.shape[1]

    # 1) One-hot token slab: row (l*Vp + v) is 1.0 where token l of the sample equals v.
    v_iota = jax.lax.broadcasted_iota(jnp.int32, (Vp, b_tile), 0)
    for l in range(L):                                   # static unroll, L is small
        ids_l = ids_ref[pl.ds(l, 1), :]                  # (1, B_TILE) int32
        oh_ref[pl.ds(l * Vp, Vp), :] = (v_iota == ids_l).astype(jnp.bfloat16)

    # 2) Embedding gather + .view reinterpretation + Conv1d over ALL output timesteps as one
    #    MXU matmul: (l_out*E, L*Vp) @ (L*Vp, B_TILE) with f32 accumulation.
    conv = jnp.dot(w_ref[...], oh_ref[...],
                   preferred_element_type=jnp.float32)   # (l_out*E, B_TILE) f32

    # 3) Global max pool over time; conv bias + ReLU hoisted out of the time reduction
    #    (exactly equivalent: max commutes with a constant add, ReLU is monotone).
    pooled = conv[0:E, :]
    for t in range(1, l_out):
        pooled = jnp.maximum(pooled, conv[t * E:(t + 1) * E, :])
    pooled = jnp.maximum(pooled + cb_ref[...], 0.0)      # (E, B_TILE)

    # 4) Linear(E -> 1) + Sigmoid as VPU multiply + sublane reduce (no M=1 MXU pass).
    logits = jnp.sum(pooled * lw_ref[...], axis=0, keepdims=True) + lb_ref[...]
    o_ref[...] = jax.nn.sigmoid(logits)                  # (1, B_TILE)


@functools.partial(jax.jit, static_argnames=("embed", "sent_length"))
def conv_model_forward(token_ids, emb_table, conv_w, conv_b, lin_w, lin_b,
                       *, embed, sent_length):
    """Full ConvModel forward. token_ids: (B, sent_length) int32 -> (B, 1) float32."""
    B = token_ids.shape[0]
    E = embed
    L = sent_length
    l_out = L - (KSIZE - 1)
    vocab = emb_table.shape[0]
    Vp = _round_up(vocab, 64)                            # padded vocab (lane/sublane friendly)

    # --- batch tiling: lane-dense tiles; >= 2 tiles when B >= 256 (v7x megacore), cap 1024 ---
    bp = _round_up(max(B, 1), 128)
    if bp <= 128:
        b_tile = bp
    else:
        b_tile = min(1024, _round_up(bp // 2, 128))
        bp = _round_up(bp, b_tile)
    num_tiles = bp // b_tile

    ids = token_ids.astype(jnp.int32)
    if bp != B:
        ids = jnp.pad(ids, ((0, bp - B), (0, 0)))        # padded rows -> garbage, sliced off
    ids2d = jnp.transpose(ids)                           # (L, bp): batch along lanes (tiny glue)

    # --- fold embedding table + PyTorch .view row-major reinterpretation + im2col conv into
    #     ONE static weight W_comb[t*E + o, l*Vp + v] (computed once per call, tiny) ---
    # W_full[t, o, j] with j = c*L + (t + k): conv tap positions expressed in the flat
    # row-major (L, E) index space of the embedding output (this IS the .view reinterpret).
    base0 = jnp.pad(conv_w, ((0, 0), (0, 0), (0, L - KSIZE))).reshape(E, E * L)
    w_full = jnp.stack([jnp.roll(base0, t, axis=1) for t in range(l_out)], axis=0)
    w_full = w_full.reshape(l_out, E, L, E).astype(jnp.float32)          # [t, o, l, e]
    emb_pad = jnp.pad(emb_table.astype(jnp.float32), ((0, Vp - vocab), (0, 0)))  # (Vp, E)
    w_comb = jnp.einsum("tole,ve->tolv", w_full, emb_pad)                # (l_out, E, L, Vp)
    w_comb = w_comb.reshape(l_out * E, L * Vp).astype(jnp.bfloat16)

    cb = conv_b.reshape(E, 1).astype(jnp.float32)
    lw = lin_w.reshape(E, 1).astype(jnp.float32)         # column: lw[o, 0] = lin_w[0, o]
    lb = lin_b.reshape(1, 1).astype(jnp.float32)

    kernel = functools.partial(_fused_kernel, embed=E, seq_len=L,
                               l_out=l_out, vocab_pad=Vp)

    out = pl.pallas_call(
        kernel,
        out_shape=jax.ShapeDtypeStruct((1, bp), jnp.float32),
        grid_spec=pltpu.PrefetchScalarGridSpec(
            num_scalar_prefetch=0,
            grid=(num_tiles,),
            in_specs=[
                pl.BlockSpec((L, b_tile), lambda i: (0, i)),             # token ids tile
                pl.BlockSpec((l_out * E, L * Vp), lambda i: (0, 0)),     # folded weight (resident)
                pl.BlockSpec((E, 1), lambda i: (0, 0)),                  # conv bias
                pl.BlockSpec((E, 1), lambda i: (0, 0)),                  # linear weight
                pl.BlockSpec((1, 1), lambda i: (0, 0)),                  # linear bias
            ],
            out_specs=pl.BlockSpec((1, b_tile), lambda i: (0, i)),       # lane-dense output
            scratch_shapes=[pltpu.VMEM((L * Vp, b_tile), jnp.bfloat16)],  # one-hot slab
        ),
        compiler_params=pltpu.CompilerParams(
            dimension_semantics=("parallel",)),
    )(ids2d, w_comb, cb, lw, lb)

    return out[0, :B].reshape(B, 1)


def _reference_forward(token_ids, emb_table, conv_w, conv_b, lin_w, lin_b,
                       embed, sent_length):
    """Pure-JAX f32 reference mirroring the PyTorch forward."""
    B = token_ids.shape[0]
    emb = jnp.take(emb_table, token_ids, axis=0)
    x = jnp.reshape(emb, (B, embed, sent_length))        # PyTorch .view (row-major reinterpret)
    l_out = sent_length - (KSIZE - 1)
    y = jnp.zeros((B, embed, l_out), jnp.float32)
    for k in range(KSIZE):
        y = y + jnp.einsum("oc,bct->bot", conv_w[:, :, k], x[:, :, k:k + l_out])
    y = y + conv_b[None, :, None]
    y = jnp.maximum(y, 0.0)
    pooled = jnp.max(y, axis=2)                          # (B, E)
    logits = pooled @ lin_w.T + lin_b                    # (B, 1)
    return jax.nn.sigmoid(logits)


if __name__ == "__main__":
    # Small, module-consistent shapes.
    VOCAB, EMBED, PADDING, SENT_LEN, BATCH = 50, 32, 0, 16, 8

    key = jax.random.PRNGKey(0)
    k_emb, k_cw, k_cb, k_lw, k_lb, k_in = jax.random.split(key, 6)

    emb_table = 0.1 * jax.random.normal(k_emb, (VOCAB, EMBED), jnp.float32)
    emb_table = emb_table.at[PADDING].set(0.0)           # nn.Embedding padding_idx row = 0
    conv_w = 0.1 * jax.random.normal(k_cw, (EMBED, EMBED, KSIZE), jnp.float32)
    conv_b = 0.1 * jax.random.normal(k_cb, (EMBED,), jnp.float32)
    lin_w = 0.1 * jax.random.normal(k_lw, (1, EMBED), jnp.float32)
    lin_b = 0.1 * jax.random.normal(k_lb, (1,), jnp.float32)

    token_ids = jax.random.randint(k_in, (BATCH, SENT_LEN), 0, VOCAB, jnp.int32)

    out = conv_model_forward(token_ids, emb_table, conv_w, conv_b, lin_w, lin_b,
                             embed=EMBED, sent_length=SENT_LEN)
    out = jax.block_until_ready(out)

    ref = _reference_forward(token_ids, emb_table, conv_w, conv_b, lin_w, lin_b,
                             EMBED, SENT_LEN)
    assert out.shape == (BATCH, 1), out.shape
    # bf16 folded weight (f32 accumulation) -> loosened tolerance vs the f32 reference.
    np.testing.assert_allclose(np.asarray(out), np.asarray(ref), rtol=2e-2, atol=2e-2)

    print("KERNEL_OK")
</pallas_src>

<mosaic_0001>
module attributes {stable_mosaic.version = 11 : i64} {
  func.func @_fused_kernel(%arg0: i32, %arg1: memref<16x128xi32, #tpu.memory_space<vmem>>, %arg2: memref<320x1024xbf16, #tpu.memory_space<vmem>>, %arg3: memref<32x1xf32, #tpu.memory_space<vmem>>, %arg4: memref<32x1xf32, #tpu.memory_space<vmem>>, %arg5: memref<1x1xf32, #tpu.memory_space<vmem>>, %arg6: memref<1x128xf32, #tpu.memory_space<vmem>>, %arg7: memref<1024x128xbf16, #tpu.memory_space<vmem>>) attributes {dimension_semantics = [#tpu.dimension_semantics<parallel>], iteration_bounds = array<i64: 1>, scalar_prefetch = 0 : i64, scratch_operands = 1 : i64, tpu.core_type = #tpu.core_type<tc>, window_params = [{transform_indices = @transform_0, window_bounds = array<i64: 16, 128>}, {pipeline_mode = #tpu.pipeline_mode<synchronous>, transform_indices = @transform_1, window_bounds = array<i64: 320, 1024>}, {pipeline_mode = #tpu.pipeline_mode<synchronous>, transform_indices = @transform_2, window_bounds = array<i64: 32, 1>}, {pipeline_mode = #tpu.pipeline_mode<synchronous>, transform_indices = @transform_3, window_bounds = array<i64: 32, 1>}, {pipeline_mode = #tpu.pipeline_mode<synchronous>, transform_indices = @transform_4, window_bounds = array<i64: 1, 1>}, {transform_indices = @transform_5, window_bounds = array<i64: 1, 128>}]} {
    %0 = tpu.iota {dimensions = array<i32: 0>} : vector<64x128xi32>
    %c0 = arith.constant 0 : index
    %c0_0 = arith.constant 0 : index
    %1 = vector.load %arg1[%c0, %c0_0] : memref<16x128xi32, #tpu.memory_space<vmem>>, vector<1x128xi32>
    %2 = vector.broadcast %1 : vector<1x128xi32> to vector<64x128xi32>
    %3 = arith.cmpi eq, %0, %2 : vector<64x128xi32>
    %4 = arith.extui %3 : vector<64x128xi1> to vector<64x128xi32>
    %5 = arith.sitofp %4 : vector<64x128xi32> to vector<64x128xf32>
    %6 = arith.truncf %5 : vector<64x128xf32> to vector<64x128xbf16>
    %c0_1 = arith.constant 0 : index
    %c0_2 = arith.constant 0 : index
    %7 = vector.load %arg7[%c0_1, %c0_2] : memref<1024x128xbf16, #tpu.memory_space<vmem>>, vector<64x128xbf16>
    tpu.vector_store %arg7[%c0_1, %c0_2], %6 {strides = array<i32>} : memref<1024x128xbf16, #tpu.memory_space<vmem>>, vector<64x128xbf16>,
    %c1 = arith.constant 1 : index
    %c0_3 = arith.constant 0 : index
    %8 = vector.load %arg1[%c1, %c0_3] : memref<16x128xi32, #tpu.memory_space<vmem>>, vector<1x128xi32>
    %9 = vector.broadcast %8 : vector<1x128xi32> to vector<64x128xi32>
    %10 = arith.cmpi eq, %0, %9 : vector<64x128xi32>
    %11 = arith.extui %10 : vector<64x128xi1> to vector<64x128xi32>
    %12 = arith.sitofp %11 : vector<64x128xi32> to vector<64x128xf32>
    %13 = arith.truncf %12 : vector<64x128xf32> to vector<64x128xbf16>
    %c64 = arith.constant 64 : index
    %c0_4 = arith.constant 0 : index
    %14 = vector.load %arg7[%c64, %c0_4] : memref<1024x128xbf16, #tpu.memory_space<vmem>>, vector<64x128xbf16>
    tpu.vector_store %arg7[%c64, %c0_4], %13 {strides = array<i32>} : memref<1024x128xbf16, #tpu.memory_space<vmem>>, vector<64x128xbf16>,
    %c2 = arith.constant 2 : index
    %c0_5 = arith.constant 0 : index
    %15 = vector.load %arg1[%c2, %c0_5] : memref<16x128xi32, #tpu.memory_space<vmem>>, vector<1x128xi32>
    %16 = vector.broadcast %15 : vector<1x128xi32> to vector<64x128xi32>
    %17 = arith.cmpi eq, %0, %16 : vector<64x128xi32>
    %18 = arith.extui %17 : vector<64x128xi1> to vector<64x128xi32>
    %19 = arith.sitofp %18 : vector<64x128xi32> to vector<64x128xf32>
    %20 = arith.truncf %19 : vector<64x128xf32> to vector<64x128xbf16>
    %c128 = arith.constant 128 : index
    %c0_6 = arith.constant 0 : index
    %21 = vector.load %arg7[%c128, %c0_6] : memref<1024x128xbf16, #tpu.memory_space<vmem>>, vector<64x128xbf16>
    tpu.vector_store %arg7[%c128, %c0_6], %20 {strides = array<i32>} : memref<1024x128xbf16, #tpu.memory_space<vmem>>, vector<64x128xbf16>,
    %c3 = arith.constant 3 : index
    %c0_7 = arith.constant 0 : index
    %22 = vector.load %arg1[%c3, %c0_7] : memref<16x128xi32, #tpu.memory_space<vmem>>, vector<1x128xi32>
    %23 = vector.broadcast %22 : vector<1x128xi32> to vector<64x128xi32>
    %24 = arith.cmpi eq, %0, %23 : vector<64x128xi32>
    %25 = arith.extui %24 : vector<64x128xi1> to vector<64x128xi32>
    %26 = arith.sitofp %25 : vector<64x128xi32> to vector<64x128xf32>
    %27 = arith.truncf %26 : vector<64x128xf32> to vector<64x128xbf16>
    %c192 = arith.constant 192 : index
    %c0_8 = arith.constant 0 : index
    %28 = vector.load %arg7[%c192, %c0_8] : memref<1024x128xbf16, #tpu.memory_space<vmem>>, vector<64x128xbf16>
    tpu.vector_store %arg7[%c192, %c0_8], %27 {strides = array<i32>} : memref<1024x128xbf16, #tpu.memory_space<vmem>>, vector<64x128xbf16>,
    %c4 = arith.constant 4 : index
    %c0_9 = arith.constant 0 : index
    %29 = vector.load %arg1[%c4, %c0_9] : memref<16x128xi32, #tpu.memory_space<vmem>>, vector<1x128xi32>
    %30 = vector.broadcast %29 : vector<1x128xi32> to vector<64x128xi32>
    %31 = arith.cmpi eq, %0, %30 : vector<64x128xi32>
    %32 = arith.extui %31 : vector<64x128xi1> to vector<64x128xi32>
    %33 = arith.sitofp %32 : vector<64x128xi32> to vector<64x128xf32>
    %34 = arith.truncf %33 : vector<64x128xf32> to vector<64x128xbf16>
    %c256 = arith.constant 256 : index
    %c0_10 = arith.constant 0 : index
    %35 = vector.load %arg7[%c256, %c0_10] : memref<1024x128xbf16, #tpu.memory_space<vmem>>, vector<64x128xbf16>
    tpu.vector_store %arg7[%c256, %c0_10], %34 {strides = array<i32>} : memref<1024x128xbf16, #tpu.memory_space<vmem>>, vector<64x128xbf16>,
    %c5 = arith.constant 5 : index
    %c0_11 = arith.constant 0 : index
    %36 = vector.load %arg1[%c5, %c0_11] : memref<16x128xi32, #tpu.memory_space<vmem>>, vector<1x128xi32>
    %37 = vector.broadcast %36 : vector<1x128xi32> to vector<64x128xi32>
    %38 = arith.cmpi eq, %0, %37 : vector<64x128xi32>
    %39 = arith.extui %38 : vector<64x128xi1> to vector<64x128xi32>
    %40 = arith.sitofp %39 : vector<64x128xi32> to vector<64x128xf32>
    %41 = arith.truncf %40 : vector<64x128xf32> to vector<64x128xbf16>
    %c320 = arith.constant 320 : index
    %c0_12 = arith.constant 0 : index
    %42 = vector.load %arg7[%c320, %c0_12] : memref<1024x128xbf16, #tpu.memory_space<vmem>>, vector<64x128xbf16>
    tpu.vector_store %arg7[%c320, %c0_12], %41 {strides = array<i32>} : memref<1024x128xbf16, #tpu.memory_space<vmem>>, vector<64x128xbf16>,
    %c6 = arith.constant 6 : index
    %c0_13 = arith.constant 0 : index
    %43 = vector.load %arg1[%c6, %c0_13] : memref<16x128xi32, #tpu.memory_space<vmem>>, vector<1x128xi32>
    %44 = vector.broadcast %43 : vector<1x128xi32> to vector<64x128xi32>
    %45 = arith.cmpi eq, %0, %44 : vector<64x128xi32>
    %46 = arith.extui %45 : vector<64x128xi1> to vector<64x128xi32>
    %47 = arith.sitofp %46 : vector<64x128xi32> to vector<64x128xf32>
    %48 = arith.truncf %47 : vector<64x128xf32> to vector<64x128xbf16>
    %c384 = arith.constant 384 : index
    %c0_14 = arith.constant 0 : index
    %49 = vector.load %arg7[%c384, %c0_14] : memref<1024x128xbf16, #tpu.memory_space<vmem>>, vector<64x128xbf16>
    tpu.vector_store %arg7[%c384, %c0_14], %48 {strides = array<i32>} : memref<1024x128xbf16, #tpu.memory_space<vmem>>, vector<64x128xbf16>,
    %c7 = arith.constant 7 : index
    %c0_15 = arith.constant 0 : index
    %50 = vector.load %arg1[%c7, %c0_15] : memref<16x128xi32, #tpu.memory_space<vmem>>, vector<1x128xi32>
    %51 = vector.broadcast %50 : vector<1x128xi32> to vector<64x128xi32>
    %52 = arith.cmpi eq, %0, %51 : vector<64x128xi32>
    %53 = arith.extui %52 : vector<64x128xi1> to vector<64x128xi32>
    %54 = arith.sitofp %53 : vector<64x128xi32> to vector<64x128xf32>
    %55 = arith.truncf %54 : vector<64x128xf32> to vector<64x128xbf16>
    %c448 = arith.constant 448 : index
    %c0_16 = arith.constant 0 : index
    %56 = vector.load %arg7[%c448, %c0_16] : memref<1024x128xbf16, #tpu.memory_space<vmem>>, vector<64x128xbf16>
    tpu.vector_store %arg7[%c448, %c0_16], %55 {strides = array<i32>} : memref<1024x128xbf16, #tpu.memory_space<vmem>>, vector<64x128xbf16>,
    %c8 = arith.constant 8 : index
    %c0_17 = arith.constant 0 : index
    %57 = vector.load %arg1[%c8, %c0_17] : memref<16x128xi32, #tpu.memory_space<vmem>>, vector<1x128xi32>
    %58 = vector.broadcast %57 : vector<1x128xi32> to vector<64x128xi32>
    %59 = arith.cmpi eq, %0, %58 : vector<64x128xi32>
    %60 = arith.extui %59 : vector<64x128xi1> to vector<64x128xi32>
    %61 = arith.sitofp %60 : vector<64x128xi32> to vector<64x128xf32>
    %62 = arith.truncf %61 : vector<64x128xf32> to vector<64x128xbf16>
    %c512 = arith.constant 512 : index
    %c0_18 = arith.constant 0 : index
    %63 = vector.load %arg7[%c512, %c0_18] : memref<1024x128xbf16, #tpu.memory_space<vmem>>, vector<64x128xbf16>
    tpu.vector_store %arg7[%c512, %c0_18], %62 {strides = array<i32>} : memref<1024x128xbf16, #tpu.memory_space<vmem>>, vector<64x128xbf16>,
    %c9 = arith.constant 9 : index
    %c0_19 = arith.constant 0 : index
    %64 = vector.load %arg1[%c9, %c0_19] : memref<16x128xi32, #tpu.memory_space<vmem>>, vector<1x128xi32>
    %65 = vector.broadcast %64 : vector<1x128xi32> to vector<64x128xi32>
    %66 = arith.cmpi eq, %0, %65 : vector<64x128xi32>
    %67 = arith.extui %66 : vector<64x128xi1> to vector<64x128xi32>
    %68 = arith.sitofp %67 : vector<64x128xi32> to vector<64x128xf32>
    %69 = arith.truncf %68 : vector<64x128xf32> to vector<64x128xbf16>
    %c576 = arith.constant 576 : index
    %c0_20 = arith.constant 0 : index
    %70 = vector.load %arg7[%c576, %c0_20] : memref<1024x128xbf16, #tpu.memory_space<vmem>>, vector<64x128xbf16>
    tpu.vector_store %arg7[%c576, %c0_20], %69 {strides = array<i32>} : memref<1024x128xbf16, #tpu.memory_space<vmem>>, vector<64x128xbf16>,
    %c10 = arith.constant 10 : index
    %c0_21 = arith.constant 0 : index
    %71 = vector.load %arg1[%c10, %c0_21] : memref<16x128xi32, #tpu.memory_space<vmem>>, vector<1x128xi32>
    %72 = vector.broadcast %71 : vector<1x128xi32> to vector<64x128xi32>
    %73 = arith.cmpi eq, %0, %72 : vector<64x128xi32>
    %74 = arith.extui %73 : vector<64x128xi1> to vector<64x128xi32>
    %75 = arith.sitofp %74 : vector<64x128xi32> to vector<64x128xf32>
    %76 = arith.truncf %75 : vector<64x128xf32> to vector<64x128xbf16>
    %c640 = arith.constant 640 : index
    %c0_22 = arith.constant 0 : index
    %77 = vector.load %arg7[%c640, %c0_22] : memref<1024x128xbf16, #tpu.memory_space<vmem>>, vector<64x128xbf16>
    tpu.vector_store %arg7[%c640, %c0_22], %76 {strides = array<i32>} : memref<1024x128xbf16, #tpu.memory_space<vmem>>, vector<64x128xbf16>,
    %c11 = arith.constant 11 : index
    %c0_23 = arith.constant 0 : index
    %78 = vector.load %arg1[%c11, %c0_23] : memref<16x128xi32, #tpu.memory_space<vmem>>, vector<1x128xi32>
    %79 = vector.broadcast %78 : vector<1x128xi32> to vector<64x128xi32>
    %80 = arith.cmpi eq, %0, %79 : vector<64x128xi32>
    %81 = arith.extui %80 : vector<64x128xi1> to vector<64x128xi32>
    %82 = arith.sitofp %81 : vector<64x128xi32> to vector<64x128xf32>
    %83 = arith.truncf %82 : vector<64x128xf32> to vector<64x128xbf16>
    %c704 = arith.constant 704 : index
    %c0_24 = arith.constant 0 : index
    %84 = vector.load %arg7[%c704, %c0_24] : memref<1024x128xbf16, #tpu.memory_space<vmem>>, vector<64x128xbf16>
    tpu.vector_store %arg7[%c704, %c0_24], %83 {strides = array<i32>} : memref<1024x128xbf16, #tpu.memory_space<vmem>>, vector<64x128xbf16>,
    %c12 = arith.constant 12 : index
    %c0_25 = arith.constant 0 : index
    %85 = vector.load %arg1[%c12, %c0_25] : memref<16x128xi32, #tpu.memory_space<vmem>>, vector<1x128xi32>
    %86 = vector.broadcast %85 : vector<1x128xi32> to vector<64x128xi32>
    %87 = arith.cmpi eq, %0, %86 : vector<64x128xi32>
    %88 = arith.extui %87 : vector<64x128xi1> to vector<64x128xi32>
    %89 = arith.sitofp %88 : vector<64x128xi32> to vector<64x128xf32>
    %90 = arith.truncf %89 : vector<64x128xf32> to vector<64x128xbf16>
    %c768 = arith.constant 768 : index
    %c0_26 = arith.constant 0 : index
    %91 = vector.load %arg7[%c768, %c0_26] : memref<1024x128xbf16, #tpu.memory_space<vmem>>, vector<64x128xbf16>
    tpu.vector_store %arg7[%c768, %c0_26], %90 {strides = array<i32>} : memref<1024x128xbf16, #tpu.memory_space<vmem>>, vector<64x128xbf16>,
    %c13 = arith.constant 13 : index
    %c0_27 = arith.constant 0 : index
    %92 = vector.load %arg1[%c13, %c0_27] : memref<16x128xi32, #tpu.memory_space<vmem>>, vector<1x128xi32>
    %93 = vector.broadcast %92 : vector<1x128xi32> to vector<64x128xi32>
    %94 = arith.cmpi eq, %0, %93 : vector<64x128xi32>
    %95 = arith.extui %94 : vector<64x128xi1> to vector<64x128xi32>
    %96 = arith.sitofp %95 : vector<64x128xi32> to vector<64x128xf32>
    %97 = arith.truncf %96 : vector<64x128xf32> to vector<64x128xbf16>
    %c832 = arith.constant 832 : index
    %c0_28 = arith.constant 0 : index
    %98 = vector.load %arg7[%c832, %c0_28] : memref<1024x128xbf16, #tpu.memory_space<vmem>>, vector<64x128xbf16>
    tpu.vector_store %arg7[%c832, %c0_28], %97 {strides = array<i32>} : memref<1024x128xbf16, #tpu.memory_space<vmem>>, vector<64x128xbf16>,
    %c14 = arith.constant 14 : index
    %c0_29 = arith.constant 0 : index
    %99 = vector.load %arg1[%c14, %c0_29] : memref<16x128xi32, #tpu.memory_space<vmem>>, vector<1x128xi32>
    %100 = vector.broadcast %99 : vector<1x128xi32> to vector<64x128xi32>
    %101 = arith.cmpi eq, %0, %100 : vector<64x128xi32>
    %102 = arith.extui %101 : vector<64x128xi1> to vector<64x128xi32>
    %103 = arith.sitofp %102 : vector<64x128xi32> to vector<64x128xf32>
    %104 = arith.truncf %103 : vector<64x128xf32> to vector<64x128xbf16>
    %c896 = arith.constant 896 : index
    %c0_30 = arith.constant 0 : index
    %105 = vector.load %arg7[%c896, %c0_30] : memref<1024x128xbf16, #tpu.memory_space<vmem>>, vector<64x128xbf16>
    tpu.vector_store %arg7[%c896, %c0_30], %104 {strides = array<i32>} : memref<1024x128xbf16, #tpu.memory_space<vmem>>, vector<64x128xbf16>,
    %c15 = arith.constant 15 : index
    %c0_31 = arith.constant 0 : index
    %106 = vector.load %arg1[%c15, %c0_31] : memref<16x128xi32, #tpu.memory_space<vmem>>, vector<1x128xi32>
    %107 = vector.broadcast %106 : vector<1x128xi32> to vector<64x128xi32>
    %108 = arith.cmpi eq, %0, %107 : vector<64x128xi32>
    %109 = arith.extui %108 : vector<64x128xi1> to vector<64x128xi32>
    %110 = arith.sitofp %109 : vector<64x128xi32> to vector<64x128xf32>
    %111 = arith.truncf %110 : vector<64x128xf32> to vector<64x128xbf16>
    %c960 = arith.constant 960 : index
    %c0_32 = arith.constant 0 : index
    %112 = vector.load %arg7[%c960, %c0_32] : memref<1024x128xbf16, #tpu.memory_space<vmem>>, vector<64x128xbf16>
    tpu.vector_store %arg7[%c960, %c0_32], %111 {strides = array<i32>} : memref<1024x128xbf16, #tpu.memory_space<vmem>>, vector<64x128xbf16>,
    %c0_33 = arith.constant 0 : index
    %c0_34 = arith.constant 0 : index
    %113 = vector.load %arg2[%c0_33, %c0_34] : memref<320x1024xbf16, #tpu.memory_space<vmem>>, vector<320x1024xbf16>
    %c0_35 = arith.constant 0 : index
    %c0_36 = arith.constant 0 : index
    %114 = vector.load %arg7[%c0_35, %c0_36] : memref<1024x128xbf16, #tpu.memory_space<vmem>>, vector<1024x128xbf16>
    %cst = arith.constant dense<0.000000e+00> : vector<320x128xf32>
    %115 = tpu.matmul %113, %114, %cst {dimension_numbers = #tpu.dot_dimension_numbers<[1], [0], [0], [1], [0, 0, 1, 1], [], []>} : vector<320x1024xbf16>, vector<1024x128xbf16>, vector<320x128xf32> -> vector<320x128xf32>
    %116 = vector.extract_strided_slice %115 {offsets = [0, 0], sizes = [32, 128], strides = [1, 1]} : vector<320x128xf32> to vector<32x128xf32>
    %117 = vector.extract_strided_slice %115 {offsets = [32, 0], sizes = [32, 128], strides = [1, 1]} : vector<320x128xf32> to vector<32x128xf32>
    %118 = arith.maximumf %116, %117 : vector<32x128xf32>
    %119 = vector.extract_strided_slice %115 {offsets = [64, 0], sizes = [32, 128], strides = [1, 1]} : vector<320x128xf32> to vector<32x128xf32>
    %120 = arith.maximumf %118, %119 : vector<32x128xf32>
    %121 = vector.extract_strided_slice %115 {offsets = [96, 0], sizes = [32, 128], strides = [1, 1]} : vector<320x128xf32> to vector<32x128xf32>
    %122 = arith.maximumf %120, %121 : vector<32x128xf32>
    %123 = vector.extract_strided_slice %115 {offsets = [128, 0], sizes = [32, 128], strides = [1, 1]} : vector<320x128xf32> to vector<32x128xf32>
    %124 = arith.maximumf %122, %123 : vector<32x128xf32>
    %125 = vector.extract_strided_slice %115 {offsets = [160, 0], sizes = [32, 128], strides = [1, 1]} : vector<320x128xf32> to vector<32x128xf32>
    %126 = arith.maximumf %124, %125 : vector<32x128xf32>
    %127 = vector.extract_strided_slice %115 {offsets = [192, 0], sizes = [32, 128], strides = [1, 1]} : vector<320x128xf32> to vector<32x128xf32>
    %128 = arith.maximumf %126, %127 : vector<32x128xf32>
    %129 = vector.extract_strided_slice %115 {offsets = [224, 0], sizes = [32, 128], strides = [1, 1]} : vector<320x128xf32> to vector<32x128xf32>
    %130 = arith.maximumf %128, %129 : vector<32x128xf32>
    %131 = vector.extract_strided_slice %115 {offsets = [256, 0], sizes = [32, 128], strides = [1, 1]} : vector<320x128xf32> to vector<32x128xf32>
    %132 = arith.maximumf %130, %131 : vector<32x128xf32>
    %133 = vector.extract_strided_slice %115 {offsets = [288, 0], sizes = [32, 128], strides = [1, 1]} : vector<320x128xf32> to vector<32x128xf32>
    %134 = arith.maximumf %132, %133 : vector<32x128xf32>
    %c0_37 = arith.constant 0 : index
    %c0_38 = arith.constant 0 : index
    %135 = vector.load %arg3[%c0_37, %c0_38] : memref<32x1xf32, #tpu.memory_space<vmem>>, vector<32x1xf32>
    %136 = vector.broadcast %135 : vector<32x1xf32> to vector<32x128xf32>
    %137 = arith.addf %134, %136 : vector<32x128xf32>
    %cst_39 = arith.constant 0.000000e+00 : f32
    %138 = vector.broadcast %cst_39 : f32 to vector<32x128xf32>
    %139 = arith.maximumf %137, %138 : vector<32x128xf32>
    %c0_40 = arith.constant 0 : index
    %c0_41 = arith.constant 0 : index
    %140 = vector.load %arg4[%c0_40, %c0_41] : memref<32x1xf32, #tpu.memory_space<vmem>>, vector<32x1xf32>
    %141 = vector.broadcast %140 : vector<32x1xf32> to vector<32x128xf32>
    %142 = arith.mulf %139, %141 : vector<32x128xf32>
    %cst_42 = arith.constant dense<0.000000e+00> : vector<128xf32>
    %143 = vector.multi_reduction <add>, %142, %cst_42 [0] : vector<32x128xf32> to vector<128xf32>
    %144 = vector.shape_cast %143 : vector<128xf32> to vector<1x128xf32>
    %c0_43 = arith.constant 0 : index
    %c0_44 = arith.constant 0 : index
    %145 = vector.load %arg5[%c0_43, %c0_44] : memref<1x1xf32, #tpu.memory_space<vmem>>, vector<1x1xf32>
    %146 = vector.broadcast %145 : vector<1x1xf32> to vector<1x128xf32>
    %147 = arith.addf %144, %146 : vector<1x128xf32>
    %148 = arith.negf %147 : vector<1x128xf32>
    %149 = math.exp %148 : vector<1x128xf32>
    %cst_45 = arith.constant 1.000000e+00 : f32
    %150 = vector.broadcast %cst_45 : f32 to vector<1x128xf32>
    %151 = arith.addf %150, %149 : vector<1x128xf32>
    %152 = arith.divf %150, %151 : vector<1x128xf32>
    %c0_46 = arith.constant 0 : index
    %c0_47 = arith.constant 0 : index
    %153 = vector.load %arg6[%c0_46, %c0_47] : memref<1x128xf32, #tpu.memory_space<vmem>>, vector<1x128xf32>
    tpu.vector_store %arg6[%c0_46, %c0_47], %152 {strides = array<i32>} : memref<1x128xf32, #tpu.memory_space<vmem>>, vector<1x128xf32>,
    return
  }
  func.func @transform_0(%arg0: i32) -> (i32, i32) {
    %c0_i32 = arith.constant 0 : i32
    %c0_i32_0 = arith.constant 0 : i32
    return %c0_i32, %arg0 : i32, i32
  }
  func.func @transform_1(%arg0: i32) -> (i32, i32) {
    %c0_i32 = arith.constant 0 : i32
    %c0_i32_0 = arith.constant 0 : i32
    %c0_i32_1 = arith.constant 0 : i32
    return %c0_i32, %c0_i32_0 : i32, i32
  }
  func.func @transform_2(%arg0: i32) -> (i32, i32) {
    %c0_i32 = arith.constant 0 : i32
    %c0_i32_0 = arith.constant 0 : i32
    %c0_i32_1 = arith.constant 0 : i32
    return %c0_i32, %c0_i32_0 : i32, i32
  }
  func.func @transform_3(%arg0: i32) -> (i32, i32) {
    %c0_i32 = arith.constant 0 : i32
    %c0_i32_0 = arith.constant 0 : i32
    %c0_i32_1 = arith.constant 0 : i32
    return %c0_i32, %c0_i32_0 : i32, i32
  }
  func.func @transform_4(%arg0: i32) -> (i32, i32) {
    %c0_i32 = arith.constant 0 : i32
    %c0_i32_0 = arith.constant 0 : i32
    %c0_i32_1 = arith.constant 0 : i32
    return %c0_i32, %c0_i32_0 : i32, i32
  }
  func.func @transform_5(%arg0: i32) -> (i32, i32) {
    %c0_i32 = arith.constant 0 : i32
    %c0_i32_0 = arith.constant 0 : i32
    return %c0_i32, %arg0 : i32, i32
  }
}

</mosaic_0001>

<bundles_post_ra>
// kernel: conv_model_forward.1
= control target key start
LH: loop header
LB: loop body
LE: loop exit
PB: predicated region body
PF: predicated region fallthrough
CT: control target
= control target key end

     0   :  { %v23_v0 = vlaneseq  ;;  %v4459_v1 = vmov 0   ;;  %v4460_v12 = vmov 0.0   ;;  %s5884_s0 = inlined_call_operand.vmem [shape: s32[16,128], index: 0, kind: input, shape index: {}]   ;;  %s5885_s1 = inlined_call_operand.vmem [shape: bf16[320,1024], index: 1, kind: input, shape index: {}]   ;;  %s5886_s2 = inlined_call_operand.vmem [shape: f32[32,1], index: 2, kind: input, shape index: {}]   ;;  %s5887_s3 = inlined_call_operand.vmem [shape: f32[32,1], index: 3, kind: input, shape index: {}]   ;;  %s5888_s4 = inlined_call_operand.<no memory space> [shape: f32[1,1], index: 4, kind: input, shape index: {}]   ;;  %s5889_s5 = inlined_call_operand.vmem [shape: f32[1,128], index: 5, kind: output, shape index: {}]  }
   0x1   :  { %2608 = vmatprep.subr.bf16.mxu0 %v4459_v1  ;;  %2801 = vmatprep.subr.bf16.mxu1 %v4459_v1  ;;  %v3524_v3 = vld [vmem:[%s5884_s0 + $0x1] ss:$0 sm:$0xff]  ;;  %v3592_v4 = vld [vmem:[%s5884_s0 + $0x5] ss:$0 sm:$0xff]  ;;  %v4552_v28 = vld [vmem:[%s5884_s0] ss:$0 sm:$0xff] }
   0x2   :  { %v4493_v2 = vshrl.u32 %v23_v0, 7  ;;  %4389 = vset.pattern.permute.xlu0 %v4459_v1  ;;  %4390 = vset.pattern.permute.xlu1 %v4459_v1  ;;  %v4562_v33 = vld [vmem:[%s5884_s0 + $0x4] ss:$0 sm:$0xff]  ;;  %v4596_v49 = vld [vmem:[%s5884_s0 + $0x3] ss:$0 sm:$0xff] }
   0x3   :  { %v4617_v56 = vld [vmem:[%s5884_s0 + $0x7] ss:$0 sm:$0xff] }
   0x4   :  { %v4504_v5 = vadd.s32 48, %v4493_v2  ;;  %v4507_v6 = vadd.s32 56, %v4493_v2  ;;  %v4510_v7 = vadd.s32 32, %v4493_v2  ;;  %v4513_v8 = vadd.s32 40, %v4493_v2 }
   0x5   :  { %v4516_v9 = vadd.s32 16, %v4493_v2  ;;  %v4519_v10 = vadd.s32 24, %v4493_v2  ;;  %v4522_v11 = vadd.s32 8, %v4493_v2  ;;  %vm106_vm0 = vcmp.eq.s32.totalorder %v4493_v2, %v3524_v3 }
   0x6   :  { %vm112_vm1 = vcmp.eq.s32.totalorder %v4504_v5, %v3524_v3  ;;  %vm113_vm2 = vcmp.eq.s32.totalorder %v4507_v6, %v3524_v3  ;;  %vm388_vm3 = vcmp.eq.s32.totalorder %v4504_v5, %v3592_v4  ;;  %vm389_vm4 = vcmp.eq.s32.totalorder %v4507_v6, %v3592_v4 }
   0x7   :  { %v3531_v13 = vsel %vm112_vm1, 1.0, %v4460_v12  ;;  %v3532_v14 = vsel %vm113_vm2, 1.0, %v4460_v12  ;;  %v3599_v15 = vsel %vm388_vm3, 1.0, %v4460_v12  ;;  %v3600_v16 = vsel %vm389_vm4, 1.0, %v4460_v12 }
   0x8   :  { %v4154_v17 = vpack.c.bf16 %v3532_v14, %v3531_v13  ;;  %v4202_v18 = vpack.c.bf16 %v3600_v16, %v3599_v15  ;;  %vm110_vm5 = vcmp.eq.s32.totalorder %v4510_v7, %v3524_v3  ;;  %vm111_vm6 = vcmp.eq.s32.totalorder %v4513_v8, %v3524_v3 }
   0x9   :  { %v3529_v19 = vsel %vm110_vm5, 1.0, %v4460_v12  ;;  %v3530_v20 = vsel %vm111_vm6, 1.0, %v4460_v12  ;;  %vm386_vm7 = vcmp.eq.s32.totalorder %v4510_v7, %v3592_v4  ;;  %vm387_vm8 = vcmp.eq.s32.totalorder %v4513_v8, %v3592_v4 }
   0xa   :  { %4330 = vst [vmem:[#allocation2 + $0x38] sm:$0xff] %v4154_v17   ;;  %4346 = vst [vmem:[#allocation2 + $0xb8] sm:$0xff] %v4202_v18   ;;  %v4151_v21 = vpack.c.bf16 %v3530_v20, %v3529_v19  ;;  %v3597_v22 = vsel %vm386_vm7, 1.0, %v4460_v12  ;;  %v3598_v23 = vsel %vm387_vm8, 1.0, %v4460_v12  ;;  %vm108_vm9 = vcmp.eq.s32.totalorder %v4516_v9, %v3524_v3 }
   0xb   :  { %v4199_v24 = vpack.c.bf16 %v3598_v23, %v3597_v22  ;;  %vm109_vm10 = vcmp.eq.s32.totalorder %v4519_v10, %v3524_v3  ;;  %v3527_v25 = vsel %vm108_vm9, 1.0, %v4460_v12  ;;  %vm384_vm11 = vcmp.eq.s32.totalorder %v4516_v9, %v3592_v4 }
   0xc   :  { %4329 = vst [vmem:[#allocation2 + $0x30] sm:$0xff] %v4151_v21   ;;  %v3528_v26 = vsel %vm109_vm10, 1.0, %v4460_v12  ;;  %vm385_vm12 = vcmp.eq.s32.totalorder %v4519_v10, %v3592_v4  ;;  %v3595_v27 = vsel %vm384_vm11, 1.0, %v4460_v12  ;;  %vm107_vm13 = vcmp.eq.s32.totalorder %v4522_v11, %v3524_v3 }
   0xd   :  { %4345 = vst [vmem:[#allocation2 + $0xb0] sm:$0xff] %v4199_v24   ;;  %v4148_v29 = vpack.c.bf16 %v3528_v26, %v3527_v25  ;;  %v3596_v30 = vsel %vm385_vm12, 1.0, %v4460_v12  ;;  %v3525_v31 = vsel %vm106_vm0, 1.0, %v4460_v12  ;;  %v3526_v32 = vsel %vm107_vm13, 1.0, %v4460_v12  ;;  %v4700_v25 = vld [vmem:[%s5884_s0 + $0x2] ss:$0 sm:$0xff] }
   0xe   :  { %v4196_v34 = vpack.c.bf16 %v3596_v30, %v3595_v27  ;;  %v4145_v35 = vpack.c.bf16 %v3526_v32, %v3525_v31  ;;  %vm382_vm14 = vcmp.eq.s32.totalorder %v4493_v2, %v3592_v4  ;;  %vm383_vm15 = vcmp.eq.s32.totalorder %v4522_v11, %v3592_v4 }
   0xf   :  { %4328 = vst [vmem:[#allocation2 + $0x28] sm:$0xff] %v4148_v29   ;;  %v3593_v36 = vsel %vm382_vm14, 1.0, %v4460_v12  ;;  %v3594_v37 = vsel %vm383_vm15, 1.0, %v4460_v12  ;;  %vm43_vm0 = vcmp.eq.s32.totalorder %v4504_v5, %v4552_v28  ;;  %vm44_vm1 = vcmp.eq.s32.totalorder %v4507_v6, %v4552_v28 }
  0x10   :  { %4344 = vst [vmem:[#allocation2 + $0xa8] sm:$0xff] %v4196_v34   ;;  %4327 = vst [vmem:[#allocation2 + $0x20] sm:$0xff] %v4145_v35   ;;  %v4193_v38 = vpack.c.bf16 %v3594_v37, %v3593_v36  ;;  %v3514_v39 = vsel %vm43_vm0, 1.0, %v4460_v12  ;;  %v3515_v40 = vsel %vm44_vm1, 1.0, %v4460_v12  ;;  %vm319_vm2 = vcmp.eq.s32.totalorder %v4504_v5, %v4562_v33  ;;  %v4745_v37 = vld [vmem:[%s5884_s0 + $0x6] ss:$0 sm:$0xff] }
  0x11   :  { %v4391_v41 = vld [vmem:[#allocation2 + $0x38] sm:$0xff]   ;;  %v4142_v42 = vpack.c.bf16 %v3515_v40, %v3514_v39  ;;  %vm320_vm3 = vcmp.eq.s32.totalorder %v4507_v6, %v4562_v33  ;;  %v3582_v43 = vsel %vm319_vm2, 1.0, %v4460_v12  ;;  %vm41_vm4 = vcmp.eq.s32.totalorder %v4510_v7, %v4552_v28 }
  0x12   :  { %v4392_v44 = vld [vmem:[#allocation2 + $0xb8] sm:$0xff]   ;;  %4343 = vst [vmem:[#allocation2 + $0xa0] sm:$0xff] %v4193_v38   ;;  %v3583_v45 = vsel %vm320_vm3, 1.0, %v4460_v12  ;;  %vm42_vm5 = vcmp.eq.s32.totalorder %v4513_v8, %v4552_v28  ;;  %vm317_vm6 = vcmp.eq.s32.totalorder %v4510_v7, %v4562_v33  ;;  %vm318_vm7 = vcmp.eq.s32.totalorder %v4513_v8, %v4562_v33  ;;  %2609 = vmatpush1.bf16.msra.mxu0 %v4391_v41 }
  0x13   :  { %v4393_v46 = vld [vmem:[#allocation2 + $0x30] sm:$0xff]   ;;  %4326 = vst [vmem:[#allocation2 + $0x18] sm:$0xff] %v4142_v42   ;;  %v4190_v47 = vpack.c.bf16 %v3583_v45, %v3582_v43  ;;  %v3512_v48 = vsel %vm41_vm4, 1.0, %v4460_v12  ;;  %vm39_vm8 = vcmp.eq.s32.totalorder %v4516_v9, %v4552_v28  ;;  %vm40_vm9 = vcmp.eq.s32.totalorder %v4519_v10, %v4552_v28  ;;  %2802 = vmatpush1.bf16.msra.mxu1 %v4392_v44 }
  0x14   :  { %2610 = vmatprep.subr.bf16.mxu0 %v4459_v1  ;;  %v4394_v50 = vld [vmem:[#allocation2 + $0xb0] sm:$0xff]   ;;  %v3513_v51 = vsel %vm42_vm5, 1.0, %v4460_v12  ;;  %vm315_vm10 = vcmp.eq.s32.totalorder %v4516_v9, %v4562_v33  ;;  %vm316_vm11 = vcmp.eq.s32.totalorder %v4519_v10, %v4562_v33  ;;  %2803 = vmatprep.subr.bf16.mxu1 %v4459_v1  ;;  %v3580_v53 = vsel %vm317_vm6, 1.0, %v4460_v12 }
  0x15   :  { %4342 = vst [vmem:[#allocation2 + $0x98] sm:$0xff] %v4190_v47   ;;  %v4139_v52 = vpack.c.bf16 %v3513_v51, %v3512_v48  ;;  %v3581_v54 = vsel %vm318_vm7, 1.0, %v4460_v12  ;;  %v3510_v55 = vsel %vm39_vm8, 1.0, %v4460_v12  ;;  %v3511_v58 = vsel %vm40_vm9, 1.0, %v4460_v12  ;;  %v4789_v51 = vld [vmem:[%s5885_s1 + $0x20] sm:$0xff] }
  0x16   :  { %v4187_v57 = vpack.c.bf16 %v3581_v54, %v3580_v53  ;;  %vm37_vm12 = vcmp.eq.s32.totalorder %v4493_v2, %v4552_v28  ;;  %2611 = vmatpush1.bf16.msra.mxu0 %v4393_v46  ;;  %v4395_v59 = vld [vmem:[#allocation2 + $0x28] sm:$0xff]   ;;  %v4136_v60 = vpack.c.bf16 %v3511_v58, %v3510_v55  ;;  %v3578_v61 = vsel %vm315_vm10, 1.0, %v4460_v12 }
  0x17   :  { %4325 = vst [vmem:[#allocation2 + $0x10] sm:$0xff] %v4139_v52   ;;  %vm38_vm13 = vcmp.eq.s32.totalorder %v4522_v11, %v4552_v28  ;;  %vm313_vm14 = vcmp.eq.s32.totalorder %v4493_v2, %v4562_v33  ;;  %2804 = vmatpush1.bf16.msra.mxu1 %v4394_v50  ;;  %2612 = vmatprep.subr.bf16.mxu0 %v4459_v1  ;;  %v4396_v62 = vld [vmem:[#allocation2 + $0xa8] sm:$0xff]   ;;  %v3579_v63 = vsel %vm316_vm11, 1.0, %v4460_v12  ;;  %v3508_v3 = vsel %vm37_vm12, 1.0, %v4460_v12  ;;  %v4397_v13 = vld [vmem:[#allocation2 + $0x20] sm:$0xff]  }
  0x18   :  { %4341 = vst [vmem:[#allocation2 + $0x90] sm:$0xff] %v4187_v57   ;;  %vm314_vm15 = vcmp.eq.s32.totalorder %v4522_v11, %v4562_v33  ;;  %vm250_vm0 = vcmp.eq.s32.totalorder %v4504_v5, %v4596_v49  ;;  %vm251_vm1 = vcmp.eq.s32.totalorder %v4507_v6, %v4596_v49  ;;  %2805 = vmatprep.subr.bf16.mxu1 %v4459_v1  ;;  %4324 = vst [vmem:[#allocation2 + $0x8] sm:$0xff] %v4136_v60   ;;  %v4784_v50 = vld [vmem:[%s5885_s1] sm:$0xff]  ;;  %v4804_v53 = vld [vmem:[%s5885_s1 + $0x8] sm:$0xff] }
  0x19   :  { %v4184_v0 = vpack.c.bf16 %v3579_v63, %v3578_v61  ;;  %vm526_vm2 = vcmp.eq.s32.totalorder %v4504_v5, %v4617_v56  ;;  %vm527_vm3 = vcmp.eq.s32.totalorder %v4507_v6, %v4617_v56  ;;  %v3509_v4 = vsel %vm38_vm13, 1.0, %v4460_v12  ;;  %v4398_v18 = vld [vmem:[#allocation2 + $0xa0] sm:$0xff]   ;;  %v4809_v54 = vld [vmem:[%s5885_s1 + $0x28] sm:$0xff] }
  0x1a   :  { %vm248_vm4 = vcmp.eq.s32.totalorder %v4510_v7, %v4596_v49  ;;  %vm249_vm5 = vcmp.eq.s32.totalorder %v4513_v8, %v4596_v49  ;;  %vm524_vm6 = vcmp.eq.s32.totalorder %v4510_v7, %v4617_v56  ;;  %2613 = vmatpush1.bf16.msra.mxu0 %v4395_v59  ;;  %v4133_v14 = vpack.c.bf16 %v3509_v4, %v3508_v3  ;;  %v4399_v28 = vld [vmem:[#allocation2 + $0x18] sm:$0xff]   ;;  %v4829_v60 = vld [vmem:[%s5884_s0 + $0x9] ss:$0 sm:$0xff]  ;;  %v4847_v3 = vld [vmem:[%s5884_s0 + $0xd] ss:$0 sm:$0xff] }
  0x1b   :  { %4340 = vst [vmem:[#allocation2 + $0x88] sm:$0xff] %v4184_v0   ;;  %v3576_v15 = vsel %vm313_vm14, 1.0, %v4460_v12  ;;  %v3577_v16 = vsel %vm314_vm15, 1.0, %v4460_v12  ;;  %v3565_v17 = vsel %vm250_vm0, 1.0, %v4460_v12  ;;  %2806 = vmatpush1.bf16.msra.mxu1 %v4396_v62  ;;  %2614 = vmatprep.subr.bf16.mxu0 %v4459_v1  ;;  %v3566_v20 = vsel %vm251_vm1, 1.0, %v4460_v12 }
  0x1c   :  { %v4181_v19 = vpack.c.bf16 %v3577_v16, %v3576_v15  ;;  %vm525_vm7 = vcmp.eq.s32.totalorder %v4513_v8, %v4617_v56  ;;  %vm246_vm8 = vcmp.eq.s32.totalorder %v4516_v9, %v4596_v49  ;;  %2807 = vmatprep.subr.bf16.mxu1 %v4459_v1  ;;  %4134 = vst [vmem:[#allocation2] sm:$0xff] %v4133_v14   ;;  %v3633_v22 = vsel %vm526_vm2, 1.0, %v4460_v12  ;;  %v4400_v31 = vld [vmem:[#allocation2 + $0x98] sm:$0xff]  }
  0x1d   :  { %v4178_v21 = vpack.c.bf16 %v3566_v20, %v3565_v17  ;;  %v3634_v23 = vsel %vm527_vm3, 1.0, %v4460_v12  ;;  %v3563_v24 = vsel %vm248_vm4, 1.0, %v4460_v12  ;;  %v3564_v27 = vsel %vm249_vm5, 1.0, %v4460_v12 }
  0x1e   :  { %4339 = vst [vmem:[#allocation2 + $0x80] sm:$0xff] %v4181_v19   ;;  %v4226_v26 = vpack.c.bf16 %v3634_v23, %v3633_v22  ;;  %vm247_vm9 = vcmp.eq.s32.totalorder %v4519_v10, %v4596_v49  ;;  %vm522_vm10 = vcmp.eq.s32.totalorder %v4516_v9, %v4617_v56  ;;  %2615 = vmatpush1.bf16.msra.mxu0 %v4397_v13  ;;  %v3631_v30 = vsel %vm524_vm6, 1.0, %v4460_v12  ;;  %v4401_v40 = vld [vmem:[#allocation2 + $0x10] sm:$0xff]  }
  0x1f   :  { %4338 = vst [vmem:[#allocation2 + $0x78] sm:$0xff] %v4178_v21   ;;  %v4175_v29 = vpack.c.bf16 %v3564_v27, %v3563_v24  ;;  %vm523_vm11 = vcmp.eq.s32.totalorder %v4519_v10, %v4617_v56  ;;  %vm244_vm12 = vcmp.eq.s32.totalorder %v4493_v2, %v4596_v49  ;;  %2808 = vmatpush1.bf16.msra.mxu1 %v4398_v18  ;;  %v3632_v32 = vsel %vm525_vm7, 1.0, %v4460_v12  ;;  %v4402_v45 = vld [vmem:[#allocation2 + $0x90] sm:$0xff]   ;;  %v4403_v55 = vld [vmem:[#allocation2 + $0x8] sm:$0xff]  }
  0x20   :  { %2616 = vmatprep.subr.bf16.mxu0 %v4459_v1  ;;  %4354 = vst [vmem:[#allocation2 + $0xf8] sm:$0xff] %v4226_v26   ;;  %vm245_vm13 = vcmp.eq.s32.totalorder %v4522_v11, %v4596_v49  ;;  %vm520_vm14 = vcmp.eq.s32.totalorder %v4493_v2, %v4617_v56  ;;  %vm521_vm15 = vcmp.eq.s32.totalorder %v4522_v11, %v4617_v56  ;;  %v3561_v34 = vsel %vm246_vm8, 1.0, %v4460_v12 }
  0x21   :  { %2809 = vmatprep.subr.bf16.mxu1 %v4459_v1  ;;  %4337 = vst [vmem:[#allocation2 + $0x70] sm:$0xff] %v4175_v29   ;;  %v4223_v33 = vpack.c.bf16 %v3632_v32, %v3631_v30  ;;  %v3562_v35 = vsel %vm247_vm9, 1.0, %v4460_v12  ;;  %v3629_v36 = vsel %vm522_vm10, 1.0, %v4460_v12  ;;  %v3630_v39 = vsel %vm523_vm11, 1.0, %v4460_v12 }
  0x22   :  { %v4172_v38 = vpack.c.bf16 %v3562_v35, %v3561_v34  ;;  %vm181_vm0 = vcmp.eq.s32.totalorder %v4504_v5, %v4700_v25  ;;  %vm182_vm1 = vcmp.eq.s32.totalorder %v4507_v6, %v4700_v25  ;;  %2617 = vmatpush1.bf16.msra.mxu0 %v4399_v28  ;;  %v4220_v41 = vpack.c.bf16 %v3630_v39, %v3629_v36  ;;  %v4404_v58 = vld [vmem:[#allocation2 + $0x88] sm:$0xff]  }
  0x23   :  { %4353 = vst [vmem:[#allocation2 + $0xf0] sm:$0xff] %v4223_v33   ;;  %v3559_v42 = vsel %vm244_vm12, 1.0, %v4460_v12  ;;  %v3560_v43 = vsel %vm245_vm13, 1.0, %v4460_v12  ;;  %v3627_v44 = vsel %vm520_vm14, 1.0, %v4460_v12  ;;  %2810 = vmatpush1.bf16.msra.mxu1 %v4400_v31  ;;  %2618 = vmatprep.subr.bf16.mxu0 %v4459_v1  ;;  %v3628_v47 = vsel %vm521_vm15, 1.0, %v4460_v12  ;;  %v4405_v15 = vld [vmem:[#allocation2] sm:$0xff]  }
  0x24   :  { %4336 = vst [vmem:[#allocation2 + $0x68] sm:$0xff] %v4172_v38   ;;  %v4169_v46 = vpack.c.bf16 %v3560_v43, %v3559_v42  ;;  %vm457_vm2 = vcmp.eq.s32.totalorder %v4504_v5, %v4745_v37  ;;  %2811 = vmatprep.subr.bf16.mxu1 %v4459_v1  ;;  %4352 = vst [vmem:[#allocation2 + $0xe8] sm:$0xff] %v4220_v41   ;;  %v4217_v48 = vpack.c.bf16 %v3628_v47, %v3627_v44 }
  0x25   :  { %v3548_v49 = vsel %vm181_vm0, 1.0, %v4460_v12  ;;  %vm458_vm3 = vcmp.eq.s32.totalorder %v4507_v6, %v4745_v37  ;;  %v3549_v52 = vsel %vm182_vm1, 1.0, %v4460_v12  ;;  %vm179_vm4 = vcmp.eq.s32.totalorder %v4510_v7, %v4700_v25  ;;  %v4406_v19 = vld [vmem:[#allocation2 + $0x80] sm:$0xff]  }
  0x26   :  { %4335 = vst [vmem:[#allocation2 + $0x60] sm:$0xff] %v4169_v46   ;;  %vm180_vm5 = vcmp.eq.s32.totalorder %v4513_v8, %v4700_v25  ;;  %vm455_vm6 = vcmp.eq.s32.totalorder %v4510_v7, %v4745_v37  ;;  %2619 = vmatpush1.bf16.msra.mxu0 %v4401_v40  ;;  %4351 = vst [vmem:[#allocation2 + $0xe0] sm:$0xff] %v4217_v48   ;;  %v4166_v56 = vpack.c.bf16 %v3549_v52, %v3548_v49  ;;  %v4407_v24 = vld [vmem:[#allocation2 + $0x78] sm:$0xff]  }
  0x27   :  { %v3616_v57 = vsel %vm457_vm2, 1.0, %v4460_v12  ;;  %vm456_vm7 = vcmp.eq.s32.totalorder %v4513_v8, %v4745_v37  ;;  %2812 = vmatpush1.bf16.msra.mxu1 %v4402_v45  ;;  %2620 = vmatprep.subr.bf16.mxu0 %v4459_v1  ;;  %v3617_v59 = vsel %vm458_vm3, 1.0, %v4460_v12  ;;  %vm177_vm8 = vcmp.eq.s32.totalorder %v4516_v9, %v4700_v25  ;;  %v4408_v30 = vld [vmem:[#allocation2 + $0xf8] sm:$0xff]  }
  0x28   :  { %vm178_vm9 = vcmp.eq.s32.totalorder %v4519_v10, %v4700_v25  ;;  %2813 = vmatprep.subr.bf16.mxu1 %v4459_v1  ;;  %4334 = vst [vmem:[#allocation2 + $0x58] sm:$0xff] %v4166_v56   ;;  %v4214_v61 = vpack.c.bf16 %v3617_v59, %v3616_v57  ;;  %v3546_v62 = vsel %vm179_vm4, 1.0, %v4460_v12  ;;  %v3547_v63 = vsel %vm180_vm5, 1.0, %v4460_v12  ;;  %v4409_v38 = vld [vmem:[#allocation2 + $0x70] sm:$0xff]   ;;  %v4970_v57 = vld [vmem:[%s5884_s0 + $0x8] ss:$0 sm:$0xff] }
  0x29   :  { %v3614_v0 = vsel %vm455_vm6, 1.0, %v4460_v12  ;;  %v4163_v4 = vpack.c.bf16 %v3547_v63, %v3546_v62  ;;  %v3615_v13 = vsel %vm456_vm7, 1.0, %v4460_v12  ;;  %vm453_vm10 = vcmp.eq.s32.totalorder %v4516_v9, %v4745_v37  ;;  %v4981_v59 = vld [vmem:[%s5884_s0 + $0xc] ss:$0 sm:$0xff] }
  0x2a   :  { %v3780_v14 = vcombine.high %v4784_v50, %v4789_v51  ;;  %2621 = vmatpush1.bf16.msra.mxu0 %v4403_v55  ;;  %4350 = vst [vmem:[#allocation2 + $0xd8] sm:$0xff] %v4214_v61   ;;  %v4211_v16 = vpack.c.bf16 %v3615_v13, %v3614_v0  ;;  %v3544_v17 = vsel %vm177_vm8, 1.0, %v4460_v12  ;;  %vm454_vm11 = vcmp.eq.s32.totalorder %v4519_v10, %v4745_v37  ;;  %v4410_v41 = vld [vmem:[#allocation2 + $0xf0] sm:$0xff]  }
  0x2b   :  { %v3782_v18 = vcombine.high %v4804_v53, %v4809_v54  ;;  %2814 = vmatpush1.bf16.msra.mxu1 %v4404_v58  ;;  %2622 = vmatprep.subr.bf16.mxu0 %v4459_v1  ;;  %4333 = vst [vmem:[#allocation2 + $0x50] sm:$0xff] %v4163_v4   ;;  %v3545_v20 = vsel %vm178_vm9, 1.0, %v4460_v12  ;;  %vm175_vm12 = vcmp.eq.s32.totalorder %v4493_v2, %v4700_v25  ;;  %v3612_v22 = vsel %vm453_vm10, 1.0, %v4460_v12  ;;  %v4411_v48 = vld [vmem:[#allocation2 + $0x68] sm:$0xff]  }
  0x2c   :  { %vm176_vm13 = vcmp.eq.s32.totalorder %v4522_v11, %v4700_v25  ;;  %vm451_vm14 = vcmp.eq.s32.totalorder %v4493_v2, %v4745_v37  ;;  %2815 = vmatprep.subr.bf16.mxu1 %v4459_v1  ;;  %4349 = vst [vmem:[#allocation2 + $0xd0] sm:$0xff] %v4211_v16   ;;  %v4160_v21 = vpack.c.bf16 %v3545_v20, %v3544_v17  ;;  %v3613_v23 = vsel %vm454_vm11, 1.0, %v4460_v12  ;;  %v4412_v52 = vld [vmem:[#allocation2 + $0xe8] sm:$0xff]  }
  0x2d   :  { %vm452_vm15 = vcmp.eq.s32.totalorder %v4522_v11, %v4745_v37  ;;  %2640 = vmatprep.mubr.bf16.mxu0 %v3780_v14  ;;  %vm664_vm0 = vcmp.eq.s32.totalorder %v4504_v5, %v4829_v60  ;;  %2833 = vmatprep.mubr.bf16.mxu1 %v3782_v18  ;;  %vm665_vm1 = vcmp.eq.s32.totalorder %v4507_v6, %v4829_v60  ;;  %v3542_v27 = vsel %vm175_vm12, 1.0, %v4460_v12  ;;  %v4413_v63 = vld [vmem:[#allocation2 + $0x60] sm:$0xff]  }
  0x2e   :  { %vm940_vm2 = vcmp.eq.s32.totalorder %v4504_v5, %v4847_v3  ;;  %vm941_vm3 = vcmp.eq.s32.totalorder %v4507_v6, %v4847_v3  ;;  %2623 = vmatpush1.bf16.msra.mxu0 %v4405_v15  ;;  %4332 = vst [vmem:[#allocation2 + $0x48] sm:$0xff] %v4160_v21   ;;  %v4208_v26 = vpack.c.bf16 %v3613_v23, %v3612_v22  ;;  %v3543_v28 = vsel %vm176_vm13, 1.0, %v4460_v12 }
  0x2f   :  { %v3610_v29 = vsel %vm451_vm14, 1.0, %v4460_v12  ;;  %2816 = vmatpush1.bf16.msra.mxu1 %v4406_v19  ;;  %2624 = vmatprep.subr.bf16.mxu0 %v4459_v1  ;;  %v4157_v31 = vpack.c.bf16 %v3543_v28, %v3542_v27  ;;  %v3611_v32 = vsel %vm452_vm15, 1.0, %v4460_v12  ;;  %vm662_vm4 = vcmp.eq.s32.totalorder %v4510_v7, %v4829_v60  ;;  %v4415_v16 = vld [vmem:[#allocation2 + $0x58] sm:$0xff]  }
  0x30   :  { %vm663_vm5 = vcmp.eq.s32.totalorder %v4513_v8, %v4829_v60  ;;  %2817 = vmatprep.subr.bf16.mxu1 %v4459_v1  ;;  %4348 = vst [vmem:[#allocation2 + $0xc8] sm:$0xff] %v4208_v26   ;;  %v4205_v25 = vpack.c.bf16 %v3611_v32, %v3610_v29  ;;  %v3667_v33 = vsel %vm664_vm0, 1.0, %v4460_v12  ;;  %v3668_v34 = vsel %vm665_vm1, 1.0, %v4460_v12 }
  0x31   :  { %v3735_v35 = vsel %vm940_vm2, 1.0, %v4460_v12  ;;  %4331 = vst [vmem:[#allocation2 + $0x40] sm:$0xff] %v4157_v31   ;;  %v4250_v36 = vpack.c.bf16 %v3668_v34, %v3667_v33  ;;  %v3736_v37 = vsel %vm941_vm3, 1.0, %v4460_v12  ;;  %vm938_vm6 = vcmp.eq.s32.totalorder %v4510_v7, %v4847_v3  ;;  %v4416_v18 = vld [vmem:[#allocation2 + $0xd8] sm:$0xff]  }
  0x32   :  { %vm939_vm7 = vcmp.eq.s32.totalorder %v4513_v8, %v4847_v3  ;;  %2625 = vmatpush2.bf16.msra.mxu0 %v4407_v24  ;;  %4347 = vst [vmem:[#allocation2 + $0xc0] sm:$0xff] %v4205_v25   ;;  %v4298_v39 = vpack.c.bf16 %v3736_v37, %v3735_v35  ;;  %v3665_v40 = vsel %vm662_vm4, 1.0, %v4460_v12  ;;  %v3666_v42 = vsel %vm663_vm5, 1.0, %v4460_v12  ;;  %v4417_v27 = vld [vmem:[#allocation2 + $0x50] sm:$0xff]  }
  0x33   :  { %2818 = vmatpush2.bf16.msra.mxu1 %v4408_v30  ;;  %2626 = vmatprep.subr.bf16.mxu0 %v4459_v1  ;;  %4362 = vst [vmem:[#allocation2 + $0x138] sm:$0xff] %v4250_v36   ;;  %vm660_vm8 = vcmp.eq.s32.totalorder %v4516_v9, %v4829_v60  ;;  %v4247_v43 = vpack.c.bf16 %v3666_v42, %v3665_v40  ;;  %v3733_v44 = vsel %vm938_vm6, 1.0, %v4460_v12  ;;  %v3734_v45 = vsel %vm939_vm7, 1.0, %v4460_v12  ;;  %v4418_v30 = vld [vmem:[#allocation2 + $0xd0] sm:$0xff]  }
  0x34   :  { %2819 = vmatprep.subr.bf16.mxu1 %v4459_v1  ;;  %4378 = vst [vmem:[#allocation2 + $0x1b8] sm:$0xff] %v4298_v39   ;;  %vm661_vm9 = vcmp.eq.s32.totalorder %v4519_v10, %v4829_v60  ;;  %v4295_v46 = vpack.c.bf16 %v3734_v45, %v3733_v44  ;;  %v3663_v47 = vsel %vm660_vm8, 1.0, %v4460_v12  ;;  %vm936_vm10 = vcmp.eq.s32.totalorder %v4516_v9, %v4847_v3  ;;  %v5044_v39 = vld [vmem:[%s5884_s0 + $0xf] ss:$0 sm:$0xff]  ;;  %v5058_v44 = vld [vmem:[%s5885_s1 + $0x40] sm:$0xff] }
  0x35   :  { %4361 = vst [vmem:[#allocation2 + $0x130] sm:$0xff] %v4247_v43   ;;  %v3664_v49 = vsel %vm661_vm9, 1.0, %v4460_v12  ;;  %vm937_vm11 = vcmp.eq.s32.totalorder %v4519_v10, %v4847_v3  ;;  %v3731_v56 = vsel %vm936_vm10, 1.0, %v4460_v12  ;;  %vm658_vm12 = vcmp.eq.s32.totalorder %v4493_v2, %v4829_v60  ;;  %v4419_v33 = vld [vmem:[#allocation2 + $0x48] sm:$0xff]   ;;  %v5063_v45 = vld [vmem:[%s5885_s1 + $0x60] sm:$0xff] }
  0x36   :  { %2627 = vmatpush2.bf16.msra.mxu0 %v4409_v38  ;;  %4377 = vst [vmem:[#allocation2 + $0x1b0] sm:$0xff] %v4295_v46   ;;  %v4244_v55 = vpack.c.bf16 %v3664_v49, %v3663_v47  ;;  %v3732_v58 = vsel %vm937_vm11, 1.0, %v4460_v12  ;;  %vm659_vm13 = vcmp.eq.s32.totalorder %v4522_v11, %v4829_v60  ;;  %v3661_v62 = vsel %vm658_vm12, 1.0, %v4460_v12  ;;  %v4414_v60 = vld [vmem:[#allocation2 + $0xe0] sm:$0xff]   ;;  %v5039_v38 = vld [vmem:[%s5884_s0 + $0xb] ss:$0 sm:$0xff] }
  0x37   :  { %2820 = vmatpush2.bf16.msra.mxu1 %v4410_v41  ;;  %2628 = vmatprep.subr.bf16.mxu0 %v4459_v1  ;;  %v4292_v61 = vpack.c.bf16 %v3732_v58, %v3731_v56  ;;  %v3662_v0 = vsel %vm659_vm13, 1.0, %v4460_v12  ;;  %vm934_vm14 = vcmp.eq.s32.totalorder %v4493_v2, %v4847_v3  ;;  %vm935_vm15 = vcmp.eq.s32.totalorder %v4522_v11, %v4847_v3  ;;  %v4420_v36 = vld [vmem:[#allocation2 + $0xc8] sm:$0xff]  }
  0x38   :  { %2821 = vmatprep.subr.bf16.mxu1 %v4459_v1  ;;  %4360 = vst [vmem:[#allocation2 + $0x128] sm:$0xff] %v4244_v55   ;;  %v4241_v4 = vpack.c.bf16 %v3662_v0, %v3661_v62  ;;  %v3729_v13 = vsel %vm934_vm14, 1.0, %v4460_v12  ;;  %v3730_v14 = vsel %vm935_vm15, 1.0, %v4460_v12  ;;  %vm595_vm0 = vcmp.eq.s32.totalorder %v4504_v5, %v4970_v57  ;;  %v4421_v43 = vld [vmem:[#allocation2 + $0x40] sm:$0xff]   ;;  %v5068_v46 = vld [vmem:[%s5885_s1 + $0x48] sm:$0xff] }
  0x39   :  { %4376 = vst [vmem:[#allocation2 + $0x1a8] sm:$0xff] %v4292_v61   ;;  %vm596_vm1 = vcmp.eq.s32.totalorder %v4507_v6, %v4970_v57  ;;  %v4289_v3 = vpack.c.bf16 %v3730_v14, %v3729_v13  ;;  %v3650_v15 = vsel %vm595_vm0, 1.0, %v4460_v12  ;;  %vm871_vm2 = vcmp.eq.s32.totalorder %v4504_v5, %v4981_v59 }
  0x3a   :  { %2629 = vmatpush2.bf16.msra.mxu0 %v4411_v48  ;;  %4359 = vst [vmem:[#allocation2 + $0x120] sm:$0xff] %v4241_v4   ;;  %vm872_vm3 = vcmp.eq.s32.totalorder %v4507_v6, %v4981_v59  ;;  %v3651_v17 = vsel %vm596_vm1, 1.0, %v4460_v12  ;;  %v3718_v20 = vsel %vm871_vm2, 1.0, %v4460_v12  ;;  %vm593_vm4 = vcmp.eq.s32.totalorder %v4510_v7, %v4970_v57  ;;  %v4423_v61 = vld [vmem:[#allocation2 + $0x138] sm:$0xff]  }
  0x3b   :  { %2822 = vmatpush2.bf16.msra.mxu1 %v4412_v52  ;;  %2630 = vmatprep.subr.bf16.mxu0 %v4459_v1  ;;  %4375 = vst [vmem:[#allocation2 + $0x1a0] sm:$0xff] %v4289_v3   ;;  %v4238_v19 = vpack.c.bf16 %v3651_v17, %v3650_v15  ;;  %v3719_v21 = vsel %vm872_vm3, 1.0, %v4460_v12  ;;  %vm594_vm5 = vcmp.eq.s32.totalorder %v4513_v8, %v4970_v57  ;;  %v3648_v23 = vsel %vm593_vm4, 1.0, %v4460_v12  ;;  %v4422_v52 = vld [vmem:[#allocation2 + $0xc0] sm:$0xff]   ;;  %v4424_v0 = vld [vmem:[#allocation2 + $0x1b8] sm:$0xff]   ;;  %v5123_v15 = vld [vmem:[%s5885_s1 + $0x88] sm:$0xff] }
  0x3c   :  { %2823 = vmatprep.subr.bf16.mxu1 %v4459_v1  ;;  %v4286_v22 = vpack.c.bf16 %v3719_v21, %v3718_v20  ;;  %vm869_vm6 = vcmp.eq.s32.totalorder %v4510_v7, %v4981_v59  ;;  %v3649_v24 = vsel %vm594_vm5, 1.0, %v4460_v12  ;;  %vm870_vm7 = vcmp.eq.s32.totalorder %v4513_v8, %v4981_v59  ;;  %v4425_v14 = vld [vmem:[#allocation2 + $0x130] sm:$0xff]   ;;  %v5118_v3 = vld [vmem:[%s5885_s1 + $0xa0] sm:$0xff] }
  0x3d   :  { %4358 = vst [vmem:[#allocation2 + $0x118] sm:$0xff] %v4238_v19   ;;  %v3716_v26 = vsel %vm869_vm6, 1.0, %v4460_v12  ;;  %v4235_v28 = vpack.c.bf16 %v3649_v24, %v3648_v23  ;;  %v3717_v29 = vsel %vm870_vm7, 1.0, %v4460_v12  ;;  %vm591_vm8 = vcmp.eq.s32.totalorder %v4516_v9, %v4970_v57  ;;  %v4426_v19 = vld [vmem:[#allocation2 + $0x1b0] sm:$0xff]   ;;  %v5136_v23 = vld [vmem:[%s5885_s1 + $0xa8] sm:$0xff] }
  0x3e   :  { %2631 = vmatpush2.bf16.msra.mxu0 %v4413_v63  ;;  %4374 = vst [vmem:[#allocation2 + $0x198] sm:$0xff] %v4286_v22   ;;  %v4283_v31 = vpack.c.bf16 %v3717_v29, %v3716_v26  ;;  %vm592_vm9 = vcmp.eq.s32.totalorder %v4519_v10, %v4970_v57  ;;  %v3646_v32 = vsel %vm591_vm8, 1.0, %v4460_v12  ;;  %vm867_vm10 = vcmp.eq.s32.totalorder %v4516_v9, %v4981_v59 }
  0x3f   :  { %2824 = vmatpush2.bf16.msra.mxu1 %v4414_v60  ;;  %2632 = vmatprep.subr.bf16.mxu0 %v4459_v1  ;;  %4357 = vst [vmem:[#allocation2 + $0x110] sm:$0xff] %v4235_v28   ;;  %v3647_v25 = vsel %vm592_vm9, 1.0, %v4460_v12  ;;  %vm868_vm11 = vcmp.eq.s32.totalorder %v4519_v10, %v4981_v59  ;;  %v3714_v35 = vsel %vm867_vm10, 1.0, %v4460_v12  ;;  %vm589_vm12 = vcmp.eq.s32.totalorder %v4493_v2, %v4970_v57 }
  0x40   :  { %2825 = vmatprep.subr.bf16.mxu1 %v4459_v1  ;;  %4373 = vst [vmem:[#allocation2 + $0x190] sm:$0xff] %v4283_v31   ;;  %v4232_v34 = vpack.c.bf16 %v3647_v25, %v3646_v32  ;;  %v3715_v37 = vsel %vm868_vm11, 1.0, %v4460_v12  ;;  %vm590_vm13 = vcmp.eq.s32.totalorder %v4522_v11, %v4970_v57  ;;  %v3644_v41 = vsel %vm589_vm12, 1.0, %v4460_v12  ;;  %v5079_v57 = vld [vmem:[%s5885_s1 + $0x68] sm:$0xff] }
  0x41   :  { %v4280_v40 = vpack.c.bf16 %v3715_v37, %v3714_v35  ;;  %v3645_v42 = vsel %vm590_vm13, 1.0, %v4460_v12  ;;  %vm865_vm14 = vcmp.eq.s32.totalorder %v4493_v2, %v4981_v59  ;;  %vm866_vm15 = vcmp.eq.s32.totalorder %v4522_v11, %v4981_v59  ;;  %v4427_v25 = vld [vmem:[#allocation2 + $0x128] sm:$0xff]  }
  0x42   :  { %2633 = vmatpush2.bf16.msra.mxu0 %v4415_v16  ;;  %4356 = vst [vmem:[#allocation2 + $0x108] sm:$0xff] %v4232_v34   ;;  %v4229_v47 = vpack.c.bf16 %v3645_v42, %v3644_v41  ;;  %v3712_v48 = vsel %vm865_vm14, 1.0, %v4460_v12  ;;  %v3713_v49 = vsel %vm866_vm15, 1.0, %v4460_v12  ;;  %v3779_v56 = vcombine.low %v4784_v50, %v4789_v51  ;;  %v4428_v34 = vld [vmem:[#allocation2 + $0x1a8] sm:$0xff]  }
  0x43   :  { %2826 = vmatpush2.bf16.msra.mxu1 %v4416_v18  ;;  %2634 = vmatprep.subr.bf16.mxu0 %v4459_v1  ;;  %4372 = vst [vmem:[#allocation2 + $0x188] sm:$0xff] %v4280_v40   ;;  %v4277_v55 = vpack.c.bf16 %v3713_v49, %v3712_v48  ;;  %vm802_vm0 = vcmp.eq.s32.totalorder %v4504_v5, %v5039_v38  ;;  %v5170_v37 = vld [vmem:[%s5884_s0 + $0xa] ss:$0 sm:$0xff]  ;;  %v5180_v40 = vld [vmem:[%s5885_s1 + $0xe0] sm:$0xff] }
  0x44   :  { %2827 = vmatprep.subr.bf16.mxu1 %v4459_v1  ;;  %4355 = vst [vmem:[#allocation2 + $0x100] sm:$0xff] %v4229_v47   ;;  %vm803_vm1 = vcmp.eq.s32.totalorder %v4507_v6, %v5039_v38  ;;  %vm1078_vm2 = vcmp.eq.s32.totalorder %v4504_v5, %v5044_v39  ;;  %v3701_v58 = vsel %vm802_vm0, 1.0, %v4460_v12  ;;  %vm1079_vm3 = vcmp.eq.s32.totalorder %v4507_v6, %v5044_v39  ;;  %v4430_v49 = vld [vmem:[#allocation2 + $0x1a0] sm:$0xff]  }
  0x45   :  { %4371 = vst [vmem:[#allocation2 + $0x180] sm:$0xff] %v4277_v55   ;;  %v3702_v50 = vsel %vm803_vm1, 1.0, %v4460_v12  ;;  %v3769_v51 = vsel %vm1078_vm2, 1.0, %v4460_v12  ;;  %v3781_v59 = vcombine.low %v4804_v53, %v4809_v54  ;;  %v3770_v63 = vsel %vm1079_vm3, 1.0, %v4460_v12  ;;  %v5112_v53 = vld [vmem:[%s5885_s1 + $0x80] sm:$0xff] }
  0x46   :  { %2635 = vmatpush2.bf16.msra.mxu0 %v4417_v27  ;;  %v4274_v62 = vpack.c.bf16 %v3702_v50, %v3701_v58  ;;  %v3788_v60 = vcombine.high %v5058_v44, %v5063_v45  ;;  %v3790_v4 = vcombine.high %v5068_v46, %v5079_v57  ;;  %v4322_v13 = vpack.c.bf16 %v3770_v63, %v3769_v51 }
  0x47   :  { %2828 = vmatpush2.bf16.msra.mxu1 %v4418_v30  ;;  %2636 = vmatprep.subr.bf16.mxu0 %v4459_v1  ;;  %vm800_vm4 = vcmp.eq.s32.totalorder %v4510_v7, %v5039_v38  ;;  %vm801_vm5 = vcmp.eq.s32.totalorder %v4513_v8, %v5039_v38  ;;  %vm1076_vm6 = vcmp.eq.s32.totalorder %v4510_v7, %v5044_v39 }
  0x48   :  { %2829 = vmatprep.subr.bf16.mxu1 %v4459_v1  ;;  %4370 = vst [vmem:[#allocation2 + $0x178] sm:$0xff] %v4274_v62   ;;  %vm1077_vm7 = vcmp.eq.s32.totalorder %v4513_v8, %v5044_v39  ;;  %4386 = vst [vmem:[#allocation2 + $0x1f8] sm:$0xff] %v4322_v13   ;;  %v3699_v54 = vsel %vm800_vm4, 1.0, %v4460_v12  ;;  %v3700_v16 = vsel %vm801_vm5, 1.0, %v4460_v12  ;;  %v3767_v17 = vsel %vm1076_vm6, 1.0, %v4460_v12  ;;  %v5252_v13 = vld [vmem:[%s5885_s1 + $0x128] sm:$0xff] }
  0x49   :  { %v3768_v18 = vsel %vm1077_vm7, 1.0, %v4460_v12  ;;  %v4271_v20 = vpack.c.bf16 %v3700_v16, %v3699_v54  ;;  %vm798_vm8 = vcmp.eq.s32.totalorder %v4516_v9, %v5039_v38  ;;  %v3787_v22 = vcombine.low %v5058_v44, %v5063_v45  ;;  %v5192_v44 = vld [vmem:[%s5885_s1 + $0xc8] sm:$0xff]  ;;  %v4433_v54 = vld [vmem:[#allocation2 + $0x110] sm:$0xff]  }
  0x4a   :  { %2637 = vmatpush2.bf16.msra.mxu0 %v4419_v33  ;;  %v4319_v21 = vpack.c.bf16 %v3768_v18, %v3767_v17  ;;  %vm799_vm9 = vcmp.eq.s32.totalorder %v4519_v10, %v5039_v38  ;;  %v3697_v24 = vsel %vm798_vm8, 1.0, %v4460_v12  ;;  %v3789_v26 = vcombine.low %v5068_v46, %v5079_v57  ;;  %v5197_v45 = vld [vmem:[%s5885_s1 + $0xe8] sm:$0xff]  ;;  %v4429_v46 = vld [vmem:[#allocation2 + $0x120] sm:$0xff]  }
  0x4b   :  { %2830 = vmatpush2.bf16.msra.mxu1 %v4420_v36  ;;  %2638 = vmatprep.subr.bf16.mxu0 %v4459_v1  ;;  %4369 = vst [vmem:[#allocation2 + $0x170] sm:$0xff] %v4271_v20   ;;  %v3698_v27 = vsel %vm799_vm9, 1.0, %v4460_v12  ;;  %vm1074_vm10 = vcmp.eq.s32.totalorder %v4516_v9, %v5044_v39  ;;  %vm1075_vm11 = vcmp.eq.s32.totalorder %v4519_v10, %v5044_v39 }
  0x4c   :  { %2831 = vmatprep.subr.bf16.mxu1 %v4459_v1  ;;  %4385 = vst [vmem:[#allocation2 + $0x1f0] sm:$0xff] %v4319_v21   ;;  %v3796_v28 = vcombine.high %v5112_v53, %v5118_v3  ;;  %v4268_v29 = vpack.c.bf16 %v3698_v27, %v3697_v24  ;;  %v3765_v30 = vsel %vm1074_vm10, 1.0, %v4460_v12  ;;  %v3766_v31 = vsel %vm1075_vm11, 1.0, %v4460_v12 }
  0x4d   :  { %v3798_v32 = vcombine.high %v5123_v15, %v5136_v23  ;;  %v4316_v33 = vpack.c.bf16 %v3766_v31, %v3765_v30  ;;  %vm796_vm12 = vcmp.eq.s32.totalorder %v4493_v2, %v5039_v38  ;;  %vm797_vm13 = vcmp.eq.s32.totalorder %v4522_v11, %v5039_v38  ;;  %v5175_v38 = vld [vmem:[%s5885_s1 + $0xc0] sm:$0xff]  ;;  %v1181_v30 = vld [vmem:[%s5885_s1 + $0x168] sm:$0xff] }
  0x4e   :  { %2639 = vmatpush2.bf16.msra.mxu0 %v4421_v43  ;;  %4368 = vst [vmem:[#allocation2 + $0x168] sm:$0xff] %v4268_v29   ;;  %v3695_v35 = vsel %vm796_vm12, 1.0, %v4460_v12  ;;  %v3696_v36 = vsel %vm797_vm13, 1.0, %v4460_v12  ;;  %vm1072_vm14 = vcmp.eq.s32.totalorder %v4493_v2, %v5044_v39  ;;  %vm1073_vm15 = vcmp.eq.s32.totalorder %v4522_v11, %v5044_v39  ;;  %v5187_v43 = vld [vmem:[%s5884_s0 + $0xe] ss:$0 sm:$0xff] }
  0x4f   :  { %2832 = vmatpush2.bf16.msra.mxu1 %v4422_v52  ;;  %2994 = vmatprep.subr.bf16.mxu0 %v4459_v1  ;;  %4384 = vst [vmem:[#allocation2 + $0x1e8] sm:$0xff] %v4316_v33   ;;  %v4265_v41 = vpack.c.bf16 %v3696_v36, %v3695_v35  ;;  %v3763_v39 = vsel %vm1072_vm14, 1.0, %v4460_v12  ;;  %v3764_v42 = vsel %vm1073_vm15, 1.0, %v4460_v12  ;;  %v3795_v48 = vcombine.low %v5112_v53, %v5118_v3  ;;  %v1177_v29 = vld [vmem:[%s5885_s1 + $0x148] sm:$0xff]  ;;  %v4438_v35 = vld [vmem:[#allocation2 + $0x180] sm:$0xff]  }
  0x50   :  { %3187 = vmatprep.subr.bf16.mxu1 %v4459_v1  ;;  %v4313_v47 = vpack.c.bf16 %v3764_v42, %v3763_v39  ;;  %vm733_vm0 = vcmp.eq.s32.totalorder %v4504_v5, %v5170_v37  ;;  %vm734_vm1 = vcmp.eq.s32.totalorder %v4507_v6, %v5170_v37  ;;  %v3797_v52 = vcombine.low %v5123_v15, %v5136_v23  ;;  %v4434_v15 = vld [vmem:[#allocation2 + $0x190] sm:$0xff]   ;;  %v4435_v23 = vld [vmem:[#allocation2 + $0x108] sm:$0xff]   ;;  %v1184_v39 = vld [vmem:[%s5885_s1 + $0x180] sm:$0xff] }
  0x51   :  { %2641 = vmatmul.mubr.bf16.vlgmr.msra.gmra.mxu0 %v3779_v56  ;;  %4367 = vst [vmem:[#allocation2 + $0x160] sm:$0xff] %v4265_v41   ;;  %v3684_v55 = vsel %vm733_vm0, 1.0, %v4460_v12  ;;  %vm1009_vm2 = vcmp.eq.s32.totalorder %v4504_v5, %v5187_v43  ;;  %vm1010_vm3 = vcmp.eq.s32.totalorder %v4507_v6, %v5187_v43  ;;  %v3804_v56 = vcombine.high %v5175_v38, %v5180_v40  ;;  %v4432_v5 = vld [vmem:[#allocation2 + $0x198] sm:$0xff]   ;;  %v5231_v6 = vld [vmem:[%s5885_s1 + $0x100] sm:$0xff] }
  0x52   :  { %2834 = vmatmul.mubr.bf16.vlgmr.msra.gmra.mxu1 %v3781_v59  ;;  %2995 = vmatpush1.bf16.msra.mxu0 %v4423_v61  ;;  %4383 = vst [vmem:[#allocation2 + $0x1e0] sm:$0xff] %v4313_v47   ;;  %v3685_v57 = vsel %vm734_vm1, 1.0, %v4460_v12  ;;  %v3752_v58 = vsel %vm1009_vm2, 1.0, %v4460_v12  ;;  %v3753_v50 = vsel %vm1010_vm3, 1.0, %v4460_v12  ;;  %v3806_v51 = vcombine.high %v5192_v44, %v5197_v45  ;;  %v4431_v59 = vld [vmem:[#allocation2 + $0x118] sm:$0xff]   ;;  %v1188_v42 = vld [vmem:[%s5885_s1 + $0x1a0] sm:$0xff] }
  0x53   :  { %3188 = vmatpush1.bf16.msra.mxu1 %v4424_v0  ;;  %2648 = vmatprep.mubr.bf16.mxu0 %v3788_v60  ;;  %v4262_v61 = vpack.c.bf16 %v3685_v57, %v3684_v55  ;;  %v4310_v62 = vpack.c.bf16 %v3753_v50, %v3752_v58  ;;  %vm731_vm4 = vcmp.eq.s32.totalorder %v4510_v7, %v5170_v37  ;;  %v4439_v41 = vld [vmem:[#allocation2 + $0x178] sm:$0xff]   ;;  %v1192_v57 = vld [vmem:[%s5885_s1 + $0x1c0] sm:$0xff] }
  0x54   :  { %2841 = vmatprep.mubr.bf16.mxu1 %v3790_v4  ;;  %2996 = vmatprep.subr.bf16.mxu0 %v4459_v1  ;;  %vm732_vm5 = vcmp.eq.s32.totalorder %v4513_v8, %v5170_v37  ;;  %vm1007_vm6 = vcmp.eq.s32.totalorder %v4510_v7, %v5187_v43  ;;  %v3682_v63 = vsel %vm731_vm4, 1.0, %v4460_v12  ;;  %vm1008_vm7 = vcmp.eq.s32.totalorder %v4513_v8, %v5187_v43  ;;  %v5242_v7 = vld [vmem:[%s5885_s1 + $0x120] sm:$0xff]  ;;  %v5247_v4 = vld [vmem:[%s5885_s1 + $0x108] sm:$0xff] }
  0x55   :  { %3189 = vmatprep.subr.bf16.mxu1 %v4459_v1  ;;  %4366 = vst [vmem:[#allocation2 + $0x158] sm:$0xff] %v4262_v61   ;;  %4382 = vst [vmem:[#allocation2 + $0x1d8] sm:$0xff] %v4310_v62   ;;  %v3683_v0 = vsel %vm732_vm5, 1.0, %v4460_v12  ;;  %v3750_v60 = vsel %vm1007_vm6, 1.0, %v4460_v12  ;;  %v3751_v53 = vsel %vm1008_vm7, 1.0, %v4460_v12  ;;  %v3803_v3 = vcombine.low %v5175_v38, %v5180_v40  ;;  %v4443_v55 = vld [vmem:[#allocation2 + $0x168] sm:$0xff]  }
  0x56   :  { %2997 = vmatpush1.bf16.msra.mxu0 %v4425_v14  ;;  %v4259_v8 = vpack.c.bf16 %v3683_v0, %v3682_v63  ;;  %v4307_v14 = vpack.c.bf16 %v3751_v53, %v3750_v60  ;;  %vm729_vm8 = vcmp.eq.s32.totalorder %v4516_v9, %v5170_v37  ;;  %vm730_vm9 = vcmp.eq.s32.totalorder %v4519_v10, %v5170_v37  ;;  %v1196_v58 = vld [vmem:[%s5885_s1 + $0x1e0] sm:$0xff]  ;;  %v1205_v53 = vld [vmem:[%s5885_s1 + $0x228] sm:$0xff] }
  0x57   :  { %3190 = vmatpush1.bf16.msra.mxu1 %v4426_v19  ;;  %2998 = vmatprep.subr.bf16.mxu0 %v4459_v1  ;;  %v3805_v16 = vcombine.low %v5192_v44, %v5197_v45  ;;  %v3680_v17 = vsel %vm729_vm8, 1.0, %v4460_v12  ;;  %v3681_v18 = vsel %vm730_vm9, 1.0, %v4460_v12  ;;  %vm1005_vm10 = vcmp.eq.s32.totalorder %v4516_v9, %v5187_v43  ;;  %v4436_v9 = vld [vmem:[#allocation2 + $0x188] sm:$0xff]   ;;  %v4441_v45 = vld [vmem:[#allocation2 + $0x170] sm:$0xff]  }
  0x58   :  { %3191 = vmatprep.subr.bf16.mxu1 %v4459_v1  ;;  %4365 = vst [vmem:[#allocation2 + $0x150] sm:$0xff] %v4259_v8   ;;  %4381 = vst [vmem:[#allocation2 + $0x1d0] sm:$0xff] %v4307_v14   ;;  %v3812_v19 = vcombine.high %v5231_v6, %v5242_v7  ;;  %v4256_v20 = vpack.c.bf16 %v3681_v18, %v3680_v17  ;;  %vm1006_vm11 = vcmp.eq.s32.totalorder %v4519_v10, %v5187_v43  ;;  %v1176_v10 = vld [vmem:[%s5885_s1 + $0x140] sm:$0xff]  ;;  %v1189_v44 = vld [vmem:[%s5885_s1 + $0x1a8] sm:$0xff] }
  0x59   :  { %2649 = vmatmul.mubr.bf16.gmra.mxu0 %v3787_v22  ;;  %v3748_v21 = vsel %vm1005_vm10, 1.0, %v4460_v12  ;;  %v3814_v22 = vcombine.high %v5247_v4, %v5252_v13  ;;  %v3749_v24 = vsel %vm1006_vm11, 1.0, %v4460_v12  ;;  %vm727_vm12 = vcmp.eq.s32.totalorder %v4493_v2, %v5170_v37  ;;  %v4445_v50 = vld [vmem:[#allocation2 + $0x160] sm:$0xff]   ;;  %v1201_v8 = vld [vmem:[%s5885_s1 + $0x208] sm:$0xff] }
  0x5a   :  { %2842 = vmatmul.mubr.bf16.gmra.mxu1 %v3789_v26  ;;  %2656 = vmatprep.mubr.bf16.mxu0 %v3796_v28  ;;  %4364 = vst [vmem:[#allocation2 + $0x148] sm:$0xff] %v4256_v20   ;;  %v4304_v26 = vpack.c.bf16 %v3749_v24, %v3748_v21  ;;  %vm728_vm13 = vcmp.eq.s32.totalorder %v4522_v11, %v5170_v37  ;;  %v3678_v27 = vsel %vm727_vm12, 1.0, %v4460_v12  ;;  %v1180_v28 = vld [vmem:[%s5885_s1 + $0x160] sm:$0xff] }
  0x5b   :  { %2849 = vmatprep.mubr.bf16.mxu1 %v3798_v32  ;;  %2999 = vmatpush1.bf16.msra.mxu0 %v4427_v25  ;;  %vm1003_vm14 = vcmp.eq.s32.totalorder %v4493_v2, %v5187_v43  ;;  %v3679_v31 = vsel %vm728_vm13, 1.0, %v4460_v12  ;;  %vm1004_vm15 = vcmp.eq.s32.totalorder %v4522_v11, %v5187_v43  ;;  %v4437_v25 = vld [vmem:[#allocation2 + $0x100] sm:$0xff]   ;;  %v3811_v37 = vcombine.low %v5231_v6, %v5242_v7  ;;  %v1185_v43 = vld [vmem:[%s5885_s1 + $0x188] sm:$0xff] }
  0x5c   :  { %3192 = vmatpush1.bf16.msra.mxu1 %v4428_v34  ;;  %3000 = vmatprep.subr.bf16.mxu0 %v4459_v1  ;;  %4380 = vst [vmem:[#allocation2 + $0x1c8] sm:$0xff] %v4304_v26   ;;  %v3746_v32 = vsel %vm1003_vm14, 1.0, %v4460_v12  ;;  %v4253_v33 = vpack.c.bf16 %v3679_v31, %v3678_v27  ;;  %v3747_v34 = vsel %vm1004_vm15, 1.0, %v4460_v12  ;;  %v3813_v11 = vcombine.low %v5247_v4, %v5252_v13  ;;  %v4440_v12 = vld [vmem:[#allocation2 + $0x1f8] sm:$0xff]   ;;  %v4446_v61 = vld [vmem:[#allocation2 + $0x1e0] sm:$0xff]  }
  0x5d   :  { %3193 = vmatprep.subr.bf16.mxu1 %v4459_v1  ;;  %v4301_v36 = vpack.c.bf16 %v3747_v34, %v3746_v32  ;;  %v3820_v38 = vcombine.high %v1176_v10, %v1180_v28  ;;  %v3822_v40 = vcombine.high %v1177_v29, %v1181_v30  ;;  %v3819_v47 = vcombine.low %v1176_v10, %v1180_v28  ;;  %v4447_v0 = vld [vmem:[#allocation2 + $0x158] sm:$0xff]   ;;  %v1200_v7 = vld [vmem:[%s5885_s1 + $0x200] sm:$0xff] }
  0x5e   :  { %4363 = vst [vmem:[#allocation2 + $0x140] sm:$0xff] %v4253_v33   ;;  %v3827_v62 = vcombine.low %v1184_v39, %v1188_v42  ;;  %v3836_v6 = vcombine.high %v1192_v57, %v1196_v58  ;;  %v4448_v60 = vld [vmem:[#allocation2 + $0x1d8] sm:$0xff]   ;;  %v1204_v4 = vld [vmem:[%s5885_s1 + $0x220] sm:$0xff]  ;;  %v3835_v14 = vcombine.low %v1192_v57, %v1196_v58  ;;  %v3845_v26 = vcombine.low %v1201_v8, %v1205_v53 }
  0x5f   :  { %3001 = vmatpush1.bf16.msra.mxu0 %v4429_v46  ;;  %4379 = vst [vmem:[#allocation2 + $0x1c0] sm:$0xff] %v4301_v36   ;;  %v4442_v46 = vld [vmem:[#allocation2 + $0x1f0] sm:$0xff]   ;;  %v1212_v20 = vld [vmem:[%s5885_s1 + $0x260] sm:$0xff]  ;;  %v1225_v36 = vld [vmem:[%s5885_s1 + $0x2c8] sm:$0xff] }
  0x60   :  { %3194 = vmatpush1.bf16.msra.mxu1 %v4430_v49  ;;  %3002 = vmatprep.subr.bf16.mxu0 %v4459_v1  ;;  %v3828_v49 = vcombine.high %v1184_v39, %v1188_v42  ;;  %v4449_v13 = vld [vmem:[#allocation2 + $0x150] sm:$0xff]   ;;  %v1216_v28 = vld [vmem:[%s5885_s1 + $0x280] sm:$0xff]  ;;  %v1233_v42 = vld [vmem:[%s5885_s1 + $0x308] sm:$0xff] }
  0x61   :  { %2657 = vmatmul.mubr.bf16.gmra.mxu0 %v3795_v48  ;;  %3195 = vmatprep.subr.bf16.mxu1 %v4459_v1  ;;  %v3821_v48 = vcombine.low %v1177_v29, %v1181_v30  ;;  %v4451_v17 = vld [vmem:[#allocation2 + $0x148] sm:$0xff]   ;;  %v1220_v29 = vld [vmem:[%s5885_s1 + $0x2a0] sm:$0xff] }
  0x62   :  { %2850 = vmatmul.mubr.bf16.gmra.mxu1 %v3797_v52  ;;  %2664 = vmatprep.mubr.bf16.mxu0 %v3804_v56  ;;  %v3830_v52 = vcombine.high %v1185_v43, %v1189_v44  ;;  %v4444_v56 = vld [vmem:[#allocation2 + $0x1e8] sm:$0xff]   ;;  %v1224_v34 = vld [vmem:[%s5885_s1 + $0x2c0] sm:$0xff] }
  0x63   :  { %2857 = vmatprep.mubr.bf16.mxu1 %v3806_v51  ;;  %3003 = vmatpush1.bf16.msra.mxu0 %v4431_v59  ;;  %v1193_v51 = vld [vmem:[%s5885_s1 + $0x1c8] sm:$0xff]  ;;  %v1236_v39 = vld [vmem:[%s5885_s1 + $0x320] sm:$0xff] }
  0x64   :  { %3196 = vmatpush1.bf16.msra.mxu1 %v4432_v5  ;;  %3004 = vmatprep.subr.bf16.mxu0 %v4459_v1  ;;  %v1197_v59 = vld [vmem:[%s5885_s1 + $0x1e8] sm:$0xff]  ;;  %v3829_v5 = vcombine.low %v1185_v43, %v1189_v44 }
  0x65   :  { %3197 = vmatprep.subr.bf16.mxu1 %v4459_v1  ;;  %v3838_v63 = vcombine.high %v1193_v51, %v1197_v59  ;;  %v4452_v18 = vld [vmem:[#allocation2 + $0x1c8] sm:$0xff]   ;;  %v4453_v21 = vld [vmem:[#allocation2 + $0x140] sm:$0xff]  }
  0x66   :  { %v4454_v24 = vld [vmem:[#allocation2 + $0x1c0] sm:$0xff]   ;;  %v1221_v30 = vld [vmem:[%s5885_s1 + $0x2a8] sm:$0xff] }
  0x67   :  { %3005 = vmatpush1.bf16.msra.mxu0 %v4433_v54  ;;  %v4450_v54 = vld [vmem:[#allocation2 + $0x1d0] sm:$0xff]   ;;  %v1237_v43 = vld [vmem:[%s5885_s1 + $0x328] sm:$0xff] }
  0x68   :  { %3198 = vmatpush1.bf16.msra.mxu1 %v4434_v15  ;;  %3006 = vmatprep.subr.bf16.mxu0 %v4459_v1  ;;  %v3844_v15 = vcombine.high %v1200_v7, %v1204_v4  ;;  %v3877_v57 = vcombine.low %v1233_v42, %v1237_v43 }
  0x69   :  { %2665 = vmatmul.mubr.bf16.gmra.mxu0 %v3803_v3  ;;  %3199 = vmatprep.subr.bf16.mxu1 %v4459_v1  ;;  %v3837_v3 = vcombine.low %v1193_v51, %v1197_v59  ;;  %v1248_v51 = vld [vmem:[%s5885_s1 + $0x380] sm:$0xff] }
  0x6a   :  { %2858 = vmatmul.mubr.bf16.gmra.mxu1 %v3805_v16  ;;  %2672 = vmatprep.mubr.bf16.mxu0 %v3812_v19  ;;  %v3846_v16 = vcombine.high %v1201_v8, %v1205_v53  ;;  %v1208_v19 = vld [vmem:[%s5885_s1 + $0x240] sm:$0xff] }
  0x6b   :  { %2865 = vmatprep.mubr.bf16.mxu1 %v3814_v22  ;;  %3007 = vmatpush1.bf16.msra.mxu0 %v4435_v23  ;;  %v1209_v22 = vld [vmem:[%s5885_s1 + $0x248] sm:$0xff]  ;;  %v3852_v10 = vcombine.high %v1208_v19, %v1212_v20  ;;  %v3851_v31 = vcombine.low %v1208_v19, %v1212_v20  ;;  %v1252_v59 = vld [vmem:[%s5885_s1 + $0x3a0] sm:$0xff] }
  0x6c   :  { %3200 = vmatpush1.bf16.msra.mxu1 %v4436_v9  ;;  %3008 = vmatprep.subr.bf16.mxu0 %v4459_v1  ;;  %v1213_v23 = vld [vmem:[%s5885_s1 + $0x268] sm:$0xff]  ;;  %v3843_v9 = vcombine.low %v1200_v7, %v1204_v4  ;;  %v1260_v7 = vld [vmem:[%s5885_s1 + $0x3e0] sm:$0xff]  ;;  %v3891_v8 = vcombine.low %v1248_v51, %v1252_v59 }
  0x6d   :  { %3201 = vmatprep.subr.bf16.mxu1 %v4459_v1  ;;  %v3854_v27 = vcombine.high %v1209_v22, %v1213_v23  ;;  %v3853_v32 = vcombine.low %v1209_v22, %v1213_v23  ;;  %v1257_v4 = vld [vmem:[%s5885_s1 + $0x3c8] sm:$0xff]  ;;  %v1272_v22 = vld [vmem:[%s5885_s1 + $0x440] sm:$0xff] }
  0x6e   :  { %v1276_v23 = vld [vmem:[%s5885_s1 + $0x460] sm:$0xff] }
  0x6f   :  { %3009 = vmatpush1.bf16.msra.mxu0 %v4437_v25  ;;  %v3860_v25 = vcombine.high %v1216_v28, %v1220_v29 }
  0x70   :  { %3202 = vmatpush1.bf16.msra.mxu1 %v4438_v35  ;;  %3010 = vmatprep.subr.bf16.mxu0 %v4459_v1  ;;  %v1228_v35 = vld [vmem:[%s5885_s1 + $0x2e0] sm:$0xff] }
  0x71   :  { %2673 = vmatmul.mubr.bf16.gmra.mxu0 %v3811_v37  ;;  %3203 = vmatprep.subr.bf16.mxu1 %v4459_v1  ;;  %v1229_v37 = vld [vmem:[%s5885_s1 + $0x2e8] sm:$0xff]  ;;  %v3867_v44 = vcombine.low %v1224_v34, %v1228_v35 }
  0x72   :  { %2866 = vmatmul.mubr.bf16.gmra.mxu1 %v3813_v11  ;;  %2680 = vmatprep.mubr.bf16.mxu0 %v3820_v38  ;;  %v3859_v11 = vcombine.low %v1216_v28, %v1220_v29  ;;  %v1280_v29 = vld [vmem:[%s5885_s1 + $0x480] sm:$0xff] }
  0x73   :  { %2873 = vmatprep.mubr.bf16.mxu1 %v3822_v40  ;;  %3011 = vmatpush2.bf16.msra.mxu0 %v4439_v41  ;;  %v3868_v40 = vcombine.high %v1224_v34, %v1228_v35  ;;  %v3870_v41 = vcombine.high %v1225_v36, %v1229_v37  ;;  %v1288_v35 = vld [vmem:[%s5885_s1 + $0x4c0] sm:$0xff] }
  0x74   :  { %3204 = vmatpush2.bf16.msra.mxu1 %v4440_v12  ;;  %3012 = vmatprep.subr.bf16.mxu0 %v4459_v1  ;;  %v1232_v12 = vld [vmem:[%s5885_s1 + $0x300] sm:$0xff] }
  0x75   :  { %3205 = vmatprep.subr.bf16.mxu1 %v4459_v1 }
  0x77   :  { %3013 = vmatpush2.bf16.msra.mxu0 %v4441_v45  ;;  %v3869_v45 = vcombine.low %v1225_v36, %v1229_v37  ;;  %v1292_v36 = vld [vmem:[%s5885_s1 + $0x4e0] sm:$0xff]  ;;  %v1289_v37 = vld [vmem:[%s5885_s1 + $0x4c8] sm:$0xff] }
  0x78   :  { %3206 = vmatpush2.bf16.msra.mxu1 %v4442_v46  ;;  %3014 = vmatprep.subr.bf16.mxu0 %v4459_v1  ;;  %v3876_v46 = vcombine.high %v1232_v12, %v1236_v39 }
  0x79   :  { %2681 = vmatmul.mubr.bf16.gmra.mxu0 %v3819_v47  ;;  %3207 = vmatprep.subr.bf16.mxu1 %v4459_v1  ;;  %v3878_v47 = vcombine.high %v1233_v42, %v1237_v43  ;;  %v1142_v42 = vld [vmem:[%s5885_s1 + $0x30] sm:$0xff]  ;;  %v1139_v43 = vld [vmem:[%s5885_s1 + $0x18] sm:$0xff] }
  0x7a   :  { %2874 = vmatmul.mubr.bf16.gmra.mxu1 %v3821_v48  ;;  %2688 = vmatprep.mubr.bf16.mxu0 %v3828_v49  ;;  %v1240_v48 = vld [vmem:[%s5885_s1 + $0x340] sm:$0xff] }
  0x7b   :  { %2881 = vmatprep.mubr.bf16.mxu1 %v3830_v52  ;;  %3015 = vmatpush2.bf16.msra.mxu0 %v4443_v55  ;;  %v1244_v49 = vld [vmem:[%s5885_s1 + $0x360] sm:$0xff]  ;;  %v1241_v52 = vld [vmem:[%s5885_s1 + $0x348] sm:$0xff] }
  0x7c   :  { %3208 = vmatpush2.bf16.msra.mxu1 %v4444_v56  ;;  %3016 = vmatprep.subr.bf16.mxu0 %v4459_v1  ;;  %v1245_v55 = vld [vmem:[%s5885_s1 + $0x368] sm:$0xff]  ;;  %v3875_v56 = vcombine.low %v1232_v12, %v1236_v39  ;;  %v3884_v58 = vcombine.high %v1240_v48, %v1244_v49  ;;  %v1138_v39 = vld [vmem:[%s5885_s1 + $0x10] sm:$0xff] }
  0x7d   :  { %3209 = vmatprep.subr.bf16.mxu1 %v4459_v1 }
  0x7f   :  { %3017 = vmatpush2.bf16.msra.mxu0 %v4445_v50  ;;  %v3886_v50 = vcombine.high %v1241_v52, %v1245_v55 }
  0x80   :  { %3210 = vmatpush2.bf16.msra.mxu1 %v4446_v61  ;;  %3018 = vmatprep.subr.bf16.mxu0 %v4459_v1  ;;  %v1249_v61 = vld [vmem:[%s5885_s1 + $0x388] sm:$0xff] }
  0x81   :  { %2689 = vmatmul.mubr.bf16.gmra.mxu0 %v3827_v62  ;;  %3211 = vmatprep.subr.bf16.mxu1 %v4459_v1  ;;  %v1253_v62 = vld [vmem:[%s5885_s1 + $0x3a8] sm:$0xff] }
  0x82   :  { %2882 = vmatmul.mubr.bf16.gmra.mxu1 %v3829_v5  ;;  %2696 = vmatprep.mubr.bf16.mxu0 %v3836_v6  ;;  %v3883_v5 = vcombine.low %v1240_v48, %v1244_v49  ;;  %v3885_v6 = vcombine.low %v1241_v52, %v1245_v55  ;;  %v3893_v53 = vcombine.low %v1249_v61, %v1253_v62  ;;  %v1146_v49 = vld [vmem:[%s5885_s1 + $0x50] sm:$0xff]  ;;  %v1147_v55 = vld [vmem:[%s5885_s1 + $0x58] sm:$0xff] }
  0x83   :  { %2889 = vmatprep.mubr.bf16.mxu1 %v3838_v63  ;;  %3019 = vmatpush2.bf16.msra.mxu0 %v4447_v0  ;;  %v3892_v63 = vcombine.high %v1248_v51, %v1252_v59  ;;  %v3894_v0 = vcombine.high %v1249_v61, %v1253_v62  ;;  %v1150_v52 = vld [vmem:[%s5885_s1 + $0x70] sm:$0xff]  ;;  %v1155_v62 = vld [vmem:[%s5885_s1 + $0x98] sm:$0xff] }
  0x84   :  { %3212 = vmatpush2.bf16.msra.mxu1 %v4448_v60  ;;  %3020 = vmatprep.subr.bf16.mxu0 %v4459_v1  ;;  %v1256_v60 = vld [vmem:[%s5885_s1 + $0x3c0] sm:$0xff]  ;;  %v1154_v59 = vld [vmem:[%s5885_s1 + $0x90] sm:$0xff] }
  0x85   :  { %3213 = vmatprep.subr.bf16.mxu1 %v4459_v1  ;;  %v1158_v61 = vld [vmem:[%s5885_s1 + $0xb0] sm:$0xff] }
  0x87   :  { %3021 = vmatpush2.bf16.msra.mxu0 %v4449_v13  ;;  %v1261_v13 = vld [vmem:[%s5885_s1 + $0x3e8] sm:$0xff] }
  0x88   :  { %3214 = vmatpush2.bf16.msra.mxu1 %v4450_v54  ;;  %3022 = vmatprep.subr.bf16.mxu0 %v4459_v1  ;;  %v3900_v54 = vcombine.high %v1256_v60, %v1260_v7  ;;  %v3901_v19 = vcombine.low %v1257_v4, %v1261_v13 }
  0x89   :  { %2697 = vmatmul.mubr.bf16.gmra.mxu0 %v3835_v14  ;;  %3215 = vmatprep.subr.bf16.mxu1 %v4459_v1  ;;  %v3902_v14 = vcombine.high %v1257_v4, %v1261_v13  ;;  %v1166_v4 = vld [vmem:[%s5885_s1 + $0xf0] sm:$0xff]  ;;  %v1163_v13 = vld [vmem:[%s5885_s1 + $0xd8] sm:$0xff] }
  0x8a   :  { %2890 = vmatmul.mubr.bf16.gmra.mxu1 %v3837_v3  ;;  %2704 = vmatprep.mubr.bf16.mxu0 %v3844_v15  ;;  %v1264_v3 = vld [vmem:[%s5885_s1 + $0x400] sm:$0xff] }
  0x8b   :  { %2897 = vmatprep.mubr.bf16.mxu1 %v3846_v16  ;;  %3023 = vmatpush2.bf16.msra.mxu0 %v4451_v17  ;;  %v1268_v15 = vld [vmem:[%s5885_s1 + $0x420] sm:$0xff]  ;;  %v1265_v16 = vld [vmem:[%s5885_s1 + $0x408] sm:$0xff] }
  0x8c   :  { %3216 = vmatpush2.bf16.msra.mxu1 %v4452_v18  ;;  %3024 = vmatprep.subr.bf16.mxu0 %v4459_v1  ;;  %v1269_v17 = vld [vmem:[%s5885_s1 + $0x428] sm:$0xff]  ;;  %v3899_v18 = vcombine.low %v1256_v60, %v1260_v7  ;;  %v3908_v20 = vcombine.high %v1264_v3, %v1268_v15  ;;  %v1162_v7 = vld [vmem:[%s5885_s1 + $0xd0] sm:$0xff] }
  0x8d   :  { %3217 = vmatprep.subr.bf16.mxu1 %v4459_v1  ;;  %v1217_v1 = vld [vmem:[%s5885_s1 + $0x288] sm:$0xff] }
  0x8e   :  { %v3862_v33 = vcombine.high %v1217_v1, %v1221_v30  ;;  %v3861_v38 = vcombine.low %v1217_v1, %v1221_v30  ;;  %v1284_v1 = vld [vmem:[%s5885_s1 + $0x4a0] sm:$0xff]  ;;  %v1281_v30 = vld [vmem:[%s5885_s1 + $0x488] sm:$0xff] }
  0x8f   :  { %3025 = vmatpush2.bf16.msra.mxu0 %v4453_v21  ;;  %v3910_v21 = vcombine.high %v1265_v16, %v1269_v17 }
  0x90   :  { %3218 = vmatpush2.bf16.msra.mxu1 %v4454_v24  ;;  %v1273_v24 = vld [vmem:[%s5885_s1 + $0x448] sm:$0xff] }
  0x91   :  { %2705 = vmatmul.mubr.bf16.gmra.mxu0 %v3843_v9  ;;  %v1277_v9 = vld [vmem:[%s5885_s1 + $0x468] sm:$0xff] }
  0x92   :  { %2898 = vmatmul.mubr.bf16.gmra.mxu1 %v3845_v26  ;;  %2712 = vmatprep.mubr.bf16.mxu0 %v3852_v10  ;;  %v3907_v26 = vcombine.low %v1264_v3, %v1268_v15  ;;  %v3909_v10 = vcombine.low %v1265_v16, %v1269_v17  ;;  %v3918_v28 = vcombine.high %v1273_v24, %v1277_v9  ;;  %v1170_v15 = vld [vmem:[%s5885_s1 + $0x110] sm:$0xff]  ;;  %v1171_v17 = vld [vmem:[%s5885_s1 + $0x118] sm:$0xff] }
  0x93   :  { %2905 = vmatprep.mubr.bf16.mxu1 %v3854_v27  ;;  %v3916_v27 = vcombine.high %v1272_v22, %v1276_v23  ;;  %v1174_v16 = vld [vmem:[%s5885_s1 + $0x130] sm:$0xff] }
  0x99   :  { %2713 = vmatmul.mubr.bf16.gmra.mxu0 %v3851_v31  ;;  %v1285_v31 = vld [vmem:[%s5885_s1 + $0x4a8] sm:$0xff] }
  0x9a   :  { %2906 = vmatmul.mubr.bf16.gmra.mxu1 %v3853_v32  ;;  %2720 = vmatprep.mubr.bf16.mxu0 %v3860_v25  ;;  %v3915_v32 = vcombine.low %v1272_v22, %v1276_v23  ;;  %v3917_v25 = vcombine.low %v1273_v24, %v1277_v9  ;;  %v3926_v34 = vcombine.high %v1281_v30, %v1285_v31  ;;  %v1178_v23 = vld [vmem:[%s5885_s1 + $0x150] sm:$0xff]  ;;  %v1179_v9 = vld [vmem:[%s5885_s1 + $0x158] sm:$0xff] }
  0x9b   :  { %2913 = vmatprep.mubr.bf16.mxu1 %v3862_v33  ;;  %v3924_v33 = vcombine.high %v1280_v29, %v1284_v1  ;;  %v1182_v24 = vld [vmem:[%s5885_s1 + $0x170] sm:$0xff] }
  0xa1   :  { %2721 = vmatmul.mubr.bf16.gmra.mxu0 %v3859_v11  ;;  %v1293_v11 = vld [vmem:[%s5885_s1 + $0x4e8] sm:$0xff] }
  0xa2   :  { %2914 = vmatmul.mubr.bf16.gmra.mxu1 %v3861_v38  ;;  %2728 = vmatprep.mubr.bf16.mxu0 %v3868_v40  ;;  %v3923_v38 = vcombine.low %v1280_v29, %v1284_v1  ;;  %v3925_v40 = vcombine.low %v1281_v30, %v1285_v31  ;;  %v3934_v12 = vcombine.high %v1289_v37, %v1293_v11 }
  0xa3   :  { %2921 = vmatprep.mubr.bf16.mxu1 %v3870_v41  ;;  %v3932_v41 = vcombine.high %v1288_v35, %v1292_v36 }
  0xa9   :  { %2729 = vmatmul.mubr.bf16.gmra.mxu0 %v3867_v44  ;;  %v1143_v44 = vld [vmem:[%s5885_s1 + $0x38] sm:$0xff] }
  0xaa   :  { %2922 = vmatmul.mubr.bf16.gmra.mxu1 %v3869_v45  ;;  %2736 = vmatprep.mubr.bf16.mxu0 %v3876_v46  ;;  %v3931_v45 = vcombine.low %v1288_v35, %v1292_v36  ;;  %v3933_v46 = vcombine.low %v1289_v37, %v1293_v11  ;;  %v3786_v48 = vcombine.high %v1139_v43, %v1143_v44  ;;  %v1187_v35 = vld [vmem:[%s5885_s1 + $0x198] sm:$0xff] }
  0xab   :  { %2929 = vmatprep.mubr.bf16.mxu1 %v3878_v47  ;;  %v3784_v47 = vcombine.high %v1138_v39, %v1142_v42  ;;  %v1191_v36 = vld [vmem:[%s5885_s1 + $0x1b8] sm:$0xff]  ;;  %v3823_v11 = vcombine.low %v1178_v23, %v1182_v24 }
  0xb1   :  { %2737 = vmatmul.mubr.bf16.gmra.mxu0 %v3875_v56  ;;  %v1151_v56 = vld [vmem:[%s5885_s1 + $0x78] sm:$0xff] }
  0xb2   :  { %2930 = vmatmul.mubr.bf16.gmra.mxu1 %v3877_v57  ;;  %2744 = vmatprep.mubr.bf16.mxu0 %v3884_v58  ;;  %v3783_v57 = vcombine.low %v1138_v39, %v1142_v42  ;;  %v3785_v58 = vcombine.low %v1139_v43, %v1143_v44  ;;  %v3794_v51 = vcombine.high %v1147_v55, %v1151_v56 }
  0xb3   :  { %2937 = vmatprep.mubr.bf16.mxu1 %v3886_v50  ;;  %v3792_v50 = vcombine.high %v1146_v49, %v1150_v52  ;;  %v3834_v42 = vcombine.high %v1187_v35, %v1191_v36 }
  0xb9   :  { %2745 = vmatmul.mubr.bf16.gmra.mxu0 %v3883_v5  ;;  %v1159_v5 = vld [vmem:[%s5885_s1 + $0xb8] sm:$0xff] }
  0xba   :  { %2938 = vmatmul.mubr.bf16.gmra.mxu1 %v3885_v6  ;;  %2752 = vmatprep.mubr.bf16.mxu0 %v3892_v63  ;;  %v3791_v6 = vcombine.low %v1146_v49, %v1150_v52  ;;  %v3793_v63 = vcombine.low %v1147_v55, %v1151_v56  ;;  %v3802_v60 = vcombine.high %v1155_v62, %v1159_v5  ;;  %v1198_v49 = vld [vmem:[%s5885_s1 + $0x1f0] sm:$0xff]  ;;  %v1195_v55 = vld [vmem:[%s5885_s1 + $0x1d8] sm:$0xff] }
  0xbb   :  { %2945 = vmatprep.mubr.bf16.mxu1 %v3894_v0  ;;  %v3800_v0 = vcombine.high %v1154_v59, %v1158_v61  ;;  %v1199_v56 = vld [vmem:[%s5885_s1 + $0x1f8] sm:$0xff] }
  0xc1   :  { %2753 = vmatmul.mubr.bf16.gmra.mxu0 %v3891_v8  ;;  %v1167_v8 = vld [vmem:[%s5885_s1 + $0xf8] sm:$0xff] }
  0xc2   :  { %2946 = vmatmul.mubr.bf16.gmra.mxu1 %v3893_v53  ;;  %2760 = vmatprep.mubr.bf16.mxu0 %v3900_v54  ;;  %v3799_v53 = vcombine.low %v1154_v59, %v1158_v61  ;;  %v3801_v54 = vcombine.low %v1155_v62, %v1159_v5  ;;  %v3810_v3 = vcombine.high %v1163_v13, %v1167_v8 }
  0xc3   :  { %2953 = vmatprep.mubr.bf16.mxu1 %v3902_v14  ;;  %v3808_v14 = vcombine.high %v1162_v7, %v1166_v4  ;;  %v3842_v5 = vcombine.high %v1195_v55, %v1199_v56 }
  0xc9   :  { %2761 = vmatmul.mubr.bf16.gmra.mxu0 %v3899_v18  ;;  %v1175_v18 = vld [vmem:[%s5885_s1 + $0x138] sm:$0xff] }
  0xca   :  { %2954 = vmatmul.mubr.bf16.gmra.mxu1 %v3901_v19  ;;  %2768 = vmatprep.mubr.bf16.mxu0 %v3908_v20  ;;  %v3807_v19 = vcombine.low %v1162_v7, %v1166_v4  ;;  %v3809_v20 = vcombine.low %v1163_v13, %v1167_v8  ;;  %v3818_v22 = vcombine.high %v1171_v17, %v1175_v18  ;;  %v1202_v4 = vld [vmem:[%s5885_s1 + $0x210] sm:$0xff] }
  0xcb   :  { %2961 = vmatprep.mubr.bf16.mxu1 %v3910_v21  ;;  %v3816_v21 = vcombine.high %v1170_v15, %v1174_v16  ;;  %v1206_v13 = vld [vmem:[%s5885_s1 + $0x230] sm:$0xff] }
  0xd1   :  { %2769 = vmatmul.mubr.bf16.gmra.mxu0 %v3907_v26  ;;  %v1183_v26 = vld [vmem:[%s5885_s1 + $0x178] sm:$0xff] }
  0xd2   :  { %2962 = vmatmul.mubr.bf16.gmra.mxu1 %v3909_v10  ;;  %2776 = vmatprep.mubr.bf16.mxu0 %v3916_v27  ;;  %v3815_v10 = vcombine.low %v1170_v15, %v1174_v16  ;;  %v3817_v27 = vcombine.low %v1171_v17, %v1175_v18  ;;  %v3826_v29 = vcombine.high %v1179_v9, %v1183_v26 }
  0xd3   :  { %2969 = vmatprep.mubr.bf16.mxu1 %v3918_v28  ;;  %v3824_v28 = vcombine.high %v1178_v23, %v1182_v24  ;;  %v3841_v16 = vcombine.low %v1195_v55, %v1199_v56  ;;  %v3848_v17 = vcombine.high %v1202_v4, %v1206_v13 }
  0xd9   :  { %2777 = vmatmul.mubr.bf16.gmra.mxu0 %v3915_v32 }
  0xda   :  { %2970 = vmatmul.mubr.bf16.gmra.mxu1 %v3917_v25  ;;  %2784 = vmatprep.mubr.bf16.mxu0 %v3924_v33  ;;  %v1186_v25 = vld [vmem:[%s5885_s1 + $0x190] sm:$0xff] }
  0xdb   :  { %2977 = vmatprep.mubr.bf16.mxu1 %v3926_v34  ;;  %v1190_v33 = vld [vmem:[%s5885_s1 + $0x1b0] sm:$0xff] }
  0xe1   :  { %2785 = vmatmul.mubr.bf16.gmra.mxu0 %v3923_v38 }
  0xe2   :  { %2978 = vmatmul.mubr.bf16.gmra.mxu1 %v3925_v40  ;;  %2792 = vmatprep.mubr.bf16.mxu0 %v3932_v41  ;;  %v3825_v40 = vcombine.low %v1179_v9, %v1183_v26  ;;  %v3832_v41 = vcombine.high %v1186_v25, %v1190_v33  ;;  %v1210_v26 = vld [vmem:[%s5885_s1 + $0x250] sm:$0xff] }
  0xe3   :  { %2985 = vmatprep.mubr.bf16.mxu1 %v3934_v12 }
  0xe9   :  { %2793 = vmatmul.mubr.bf16.gmra.mxu0 %v3931_v45 }
  0xea   :  { %2986 = vmatmul.mubr.bf16.gmra.mxu1 %v3933_v46  ;;  %3026 = vmatprep.mubr.bf16.mxu0 %v3784_v47 }
  0xeb   :  { %3219 = vmatprep.mubr.bf16.mxu1 %v3786_v48  ;;  %v1194_v48 = vld [vmem:[%s5885_s1 + $0x1d0] sm:$0xff] }
  0xec   :  { %v3840_v59 = vcombine.high %v1194_v48, %v1198_v49 }
  0xf1   :  { %3027 = vmatmul.mubr.bf16.vlgmr.msra.gmra.mxu0 %v3783_v57 }
  0xf2   :  { %3220 = vmatmul.mubr.bf16.vlgmr.msra.gmra.mxu1 %v3785_v58  ;;  %3034 = vmatprep.mubr.bf16.mxu0 %v3792_v50  ;;  %v3831_v58 = vcombine.low %v1186_v25, %v1190_v33 }
  0xf3   :  { %3227 = vmatprep.mubr.bf16.mxu1 %v3794_v51  ;;  %v3833_v51 = vcombine.low %v1187_v35, %v1191_v36 }
  0xf9   :  { %3035 = vmatmul.mubr.bf16.gmra.mxu0 %v3791_v6 }
  0xfa   :  { %3228 = vmatmul.mubr.bf16.gmra.mxu1 %v3793_v63  ;;  %3042 = vmatprep.mubr.bf16.mxu0 %v3800_v0 }
  0xfb   :  { %3235 = vmatprep.mubr.bf16.mxu1 %v3802_v60 }
 0x101   :  { %3043 = vmatmul.mubr.bf16.gmra.mxu0 %v3799_v53  ;;  %v1203_v53 = vld [vmem:[%s5885_s1 + $0x218] sm:$0xff] }
 0x102   :  { %3236 = vmatmul.mubr.bf16.gmra.mxu1 %v3801_v54  ;;  %3050 = vmatprep.mubr.bf16.mxu0 %v3808_v14  ;;  %v1207_v54 = vld [vmem:[%s5885_s1 + $0x238] sm:$0xff] }
 0x103   :  { %3243 = vmatprep.mubr.bf16.mxu1 %v3810_v3  ;;  %v3839_v3 = vcombine.low %v1194_v48, %v1198_v49  ;;  %v3849_v25 = vcombine.low %v1203_v53, %v1207_v54 }
 0x109   :  { %3051 = vmatmul.mubr.bf16.gmra.mxu0 %v3807_v19 }
 0x10a   :  { %3244 = vmatmul.mubr.bf16.gmra.mxu1 %v3809_v20  ;;  %3058 = vmatprep.mubr.bf16.mxu0 %v3816_v21  ;;  %v3850_v20 = vcombine.high %v1203_v53, %v1207_v54 }
 0x10b   :  { %3251 = vmatprep.mubr.bf16.mxu1 %v3818_v22 }
 0x111   :  { %v2642_v1 = vpop.f32.mrf.mxu0  ;;  %3059 = vmatmul.mubr.bf16.gmra.mxu0 %v3815_v10  ;;  %v1214_v10 = vld [vmem:[%s5885_s1 + $0x270] sm:$0xff] }
 0x112   :  { %v2835_v30 = vpop.f32.mrf.mxu1  ;;  %3252 = vmatmul.mubr.bf16.gmra.mxu1 %v3817_v27  ;;  %3066 = vmatprep.mubr.bf16.mxu0 %v3824_v28  ;;  %v1211_v28 = vld [vmem:[%s5885_s1 + $0x258] sm:$0xff]  ;;  %v3856_v33 = vcombine.high %v1210_v26, %v1214_v10  ;;  %v3855_v48 = vcombine.low %v1210_v26, %v1214_v10  ;;  %v1234_v26 = vld [vmem:[%s5885_s1 + $0x310] sm:$0xff] }
 0x113   :  { %v5565_v31 = vadd.f32 %v2835_v30, %v2642_v1  ;;  %v2644_v32 = vpop.f32.mrf.mxu0  ;;  %3259 = vmatprep.mubr.bf16.mxu1 %v3826_v29  ;;  %v1215_v29 = vld [vmem:[%s5885_s1 + $0x278] sm:$0xff]  ;;  %v3847_v30 = vcombine.low %v1202_v4, %v1206_v13  ;;  %v1238_v10 = vld [vmem:[%s5885_s1 + $0x330] sm:$0xff] }
 0x114   :  { %v2837_v34 = vpop.f32.mrf.mxu1  ;;  %v3858_v36 = vcombine.high %v1211_v28, %v1215_v29  ;;  %v1231_v4 = vld [vmem:[%s5885_s1 + $0x2f8] sm:$0xff] }
 0x115   :  { %v2645_v37 = vpop.f32.mrf.mxu0 }
 0x116   :  { %v2838_v38 = vpop.f32.mrf.mxu1 }
 0x117   :  { %v5579_v12 = vadd.f32 %v2838_v38, %v2645_v37  ;;  %v2647_v39 = vpop.f32.mrf.mxu0 }
 0x118   :  { %v2840_v43 = vpop.f32.mrf.mxu1  ;;  %v1218_v39 = vld [vmem:[%s5885_s1 + $0x290] sm:$0xff] }
 0x119   :  { %v2650_v44 = vpop.f32.mrf.mxu0  ;;  %3067 = vmatmul.mubr.bf16.gmra.mxu0 %v3823_v11 }
 0x11a   :  { %v2843_v45 = vpop.f32.mrf.mxu1  ;;  %3260 = vmatmul.mubr.bf16.gmra.mxu1 %v3825_v40  ;;  %3074 = vmatprep.mubr.bf16.mxu0 %v3832_v41 }
 0x11b   :  { %v5581_v46 = vadd.f32 %v2843_v45, %v2650_v44  ;;  %v2652_v47 = vpop.f32.mrf.mxu0  ;;  %3267 = vmatprep.mubr.bf16.mxu1 %v3834_v42  ;;  %v1222_v42 = vld [vmem:[%s5885_s1 + $0x2b0] sm:$0xff]  ;;  %v1219_v44 = vld [vmem:[%s5885_s1 + $0x298] sm:$0xff] }
 0x11c   :  { %v2845_v52 = vpop.f32.mrf.mxu1  ;;  %v1223_v45 = vld [vmem:[%s5885_s1 + $0x2b8] sm:$0xff]  ;;  %v3864_v55 = vcombine.high %v1218_v39, %v1222_v42 }
 0x11d   :  { %v2653_v57 = vpop.f32.mrf.mxu0  ;;  %v3857_v52 = vcombine.low %v1211_v28, %v1215_v29  ;;  %v3865_v54 = vcombine.low %v1219_v44, %v1223_v45  ;;  %v1235_v28 = vld [vmem:[%s5885_s1 + $0x318] sm:$0xff] }
 0x11e   :  { %v2846_v50 = vpop.f32.mrf.mxu1  ;;  %v1239_v29 = vld [vmem:[%s5885_s1 + $0x338] sm:$0xff] }
 0x11f   :  { %v5595_v61 = vadd.f32 %v2846_v50, %v2653_v57  ;;  %v2655_v62 = vpop.f32.mrf.mxu0 }
 0x120   :  { %v2848_v6 = vpop.f32.mrf.mxu1 }
 0x121   :  { %v2658_v63 = vpop.f32.mrf.mxu0  ;;  %3075 = vmatmul.mubr.bf16.gmra.mxu0 %v3831_v58  ;;  %v3866_v58 = vcombine.high %v1219_v44, %v1223_v45  ;;  %v1226_v6 = vld [vmem:[%s5885_s1 + $0x2d0] sm:$0xff] }
 0x122   :  { %v2851_v0 = vpop.f32.mrf.mxu1  ;;  %3268 = vmatmul.mubr.bf16.gmra.mxu1 %v3833_v51  ;;  %3082 = vmatprep.mubr.bf16.mxu0 %v3840_v59  ;;  %v3450_v45 = vld [vmem:[%s5887_s3 + $0x10] sm:$0xff] }
 0x123   :  { %v5597_v60 = vadd.f32 %v2851_v0, %v2658_v63  ;;  %v2660_v7 = vpop.f32.mrf.mxu0  ;;  %3275 = vmatprep.mubr.bf16.mxu1 %v3842_v5  ;;  %v1230_v63 = vld [vmem:[%s5885_s1 + $0x2f0] sm:$0xff] }
 0x124   :  { %v2853_v8 = vpop.f32.mrf.mxu1  ;;  %v1227_v7 = vld [vmem:[%s5885_s1 + $0x2d8] sm:$0xff] }
 0x125   :  { %v2661_v14 = vpop.f32.mrf.mxu0  ;;  %v3863_v8 = vcombine.low %v1218_v39, %v1222_v42  ;;  %v3419_v42 = vld [vmem:[%s5886_s2 + $0x18] sm:$0xff] }
 0x126   :  { %v2854_v15 = vpop.f32.mrf.mxu1 }
 0x127   :  { %v5611_v18 = vadd.f32 %v2854_v15, %v2661_v14  ;;  %v2663_v19 = vpop.f32.mrf.mxu0  ;;  %v3872_v14 = vcombine.high %v1226_v6, %v1230_v63 }
 0x128   :  { %v2856_v21 = vpop.f32.mrf.mxu1 }
 0x129   :  { %v2666_v22 = vpop.f32.mrf.mxu0  ;;  %3083 = vmatmul.mubr.bf16.gmra.mxu0 %v3839_v3  ;;  %v3416_v3 = vld [vmem:[%s5886_s2] sm:$0xff] }
 0x12a   :  { %v2859_v23 = vpop.f32.mrf.mxu1  ;;  %3276 = vmatmul.mubr.bf16.gmra.mxu1 %v3841_v16  ;;  %3090 = vmatprep.mubr.bf16.mxu0 %v3848_v17  ;;  %v3874_v17 = vcombine.high %v1227_v7, %v1231_v4 }
 0x12b   :  { %v5613_v24 = vadd.f32 %v2859_v23, %v2666_v22  ;;  %v2668_v9 = vpop.f32.mrf.mxu0  ;;  %3283 = vmatprep.mubr.bf16.mxu1 %v3850_v20  ;;  %3422 = vperm.xlu0 %4389, %v3416_v3   ;;  %v3417_v22 = vld [vmem:[%s5886_s2 + $0x8] sm:$0xff] }
 0x12c   :  { %v2861_v27 = vpop.f32.mrf.mxu1 }
 0x12d   :  { %v2669_v1 = vpop.f32.mrf.mxu0 }
 0x12e   :  { %v2862_v32 = vpop.f32.mrf.mxu1 }
 0x12f   :  { %v5627_v34 = vadd.f32 %v2862_v32, %v2669_v1  ;;  %v2671_v35 = vpop.f32.mrf.mxu0  ;;  %3427 = vperm.xlu0 %4389, %v3417_v22   ;;  %v3418_v1 = vld [vmem:[%s5886_s2 + $0x10] sm:$0xff]  ;;  %v3871_v32 = vcombine.low %v1226_v6, %v1230_v63  ;;  %v3881_v6 = vcombine.low %v1235_v28, %v1239_v29  ;;  %v1255_v22 = vld [vmem:[%s5885_s1 + $0x3b8] sm:$0xff] }
 0x130   :  { %v2864_v37 = vpop.f32.mrf.mxu1  ;;  %3432 = vperm.xlu1 %4390, %v3418_v1   ;;  %v3880_v35 = vcombine.high %v1234_v26, %v1238_v10 }
 0x131   :  { %v2674_v11 = vpop.f32.mrf.mxu0  ;;  %3091 = vmatmul.mubr.bf16.gmra.mxu0 %v3847_v30  ;;  %v10_v37 = vstv %s5888_s4 }
 0x132   :  { %v2867_v38 = vpop.f32.mrf.mxu1  ;;  %3284 = vmatmul.mubr.bf16.gmra.mxu1 %v3849_v25  ;;  %3098 = vmatprep.mubr.bf16.mxu0 %v3856_v33  ;;  %v3873_v33 = vcombine.low %v1227_v7, %v1231_v4  ;;  %11 = vst [vmem:[#allocation3] sm:$0x1] %v10_v37  ;;  %v1258_v37 = vld [vmem:[%s5885_s1 + $0x3d0] sm:$0xff] }
 0x133   :  { %v5629_v40 = vadd.f32 %v2867_v38, %v2674_v11  ;;  %v2676_v41 = vpop.f32.mrf.mxu0  ;;  %3291 = vmatprep.mubr.bf16.mxu1 %v3858_v36  ;;  %v3448_v36 = vld [vmem:[%s5887_s3] sm:$0xff] }
 0x134   :  { %v2869_v43 = vpop.f32.mrf.mxu1  ;;  %v3882_v41 = vcombine.high %v1235_v28, %v1239_v29  ;;  %3454 = vperm.xlu0 %4389, %v3448_v36   ;;  %3437 = vperm.xlu1 %4390, %v3419_v42   ;;  %v1263_v42 = vld [vmem:[%s5885_s1 + $0x3f8] sm:$0xff] }
 0x135   :  { %v2677_v47 = vpop.f32.mrf.mxu0 }
 0x136   :  { %v2870_v49 = vpop.f32.mrf.mxu1 }
 0x137   :  { %v5643_v56 = vadd.f32 %v2870_v49, %v2677_v47  ;;  %v2679_v57 = vpop.f32.mrf.mxu0  ;;  %v1242_v49 = vld [vmem:[%s5885_s1 + $0x350] sm:$0xff] }
 0x138   :  { %v2872_v50 = vpop.f32.mrf.mxu1  ;;  %3464 = vperm.xlu0 %4389, %v3450_v45   ;;  %v1243_v57 = vld [vmem:[%s5885_s1 + $0x358] sm:$0xff] }
 0x139   :  { %v2682_v51 = vpop.f32.mrf.mxu0  ;;  %3099 = vmatmul.mubr.bf16.gmra.mxu0 %v3855_v48  ;;  %v3449_v50 = vld [vmem:[%s5887_s3 + $0x8] sm:$0xff] }
 0x13a   :  { %v2875_v59 = vpop.f32.mrf.mxu1  ;;  %3292 = vmatmul.mubr.bf16.gmra.mxu1 %v3857_v52  ;;  %3106 = vmatprep.mubr.bf16.mxu0 %v3864_v55  ;;  %v1246_v52 = vld [vmem:[%s5885_s1 + $0x370] sm:$0xff] }
 0x13b   :  { %v5645_v62 = vadd.f32 %v2875_v59, %v2682_v51  ;;  %v2684_v5 = vpop.f32.mrf.mxu0  ;;  %3299 = vmatprep.mubr.bf16.mxu1 %v3866_v58  ;;  %v1247_v58 = vld [vmem:[%s5885_s1 + $0x378] sm:$0xff]  ;;  %v3879_v59 = vcombine.low %v1234_v26, %v1238_v10  ;;  %3459 = vperm.xlu1 %4390, %v3449_v50   ;;  %v3888_v63 = vcombine.high %v1242_v49, %v1246_v52 }
 0x13c   :  { %v2877_v0 = vpop.f32.mrf.mxu1  ;;  %v3887_v26 = vcombine.low %v1242_v49, %v1246_v52 }
 0x13d   :  { %v2685_v13 = vpop.f32.mrf.mxu0  ;;  %v3485_v0 = vld [vmem:[#allocation3] sm:$0x1] }
 0x13e   :  { %v2878_v53 = vpop.f32.mrf.mxu1  ;;  %3488 = vperm.xlu0 %4389, %v3485_v0  }
 0x13f   :  { %v5662_v15 = vadd.f32 %v2878_v53, %v2685_v13  ;;  %v2687_v16 = vpop.f32.mrf.mxu0  ;;  %v3890_v13 = vcombine.high %v1243_v57, %v1247_v58  ;;  %v3451_v53 = vld [vmem:[%s5887_s3 + $0x18] sm:$0xff] }
 0x140   :  { %v2880_v19 = vpop.f32.mrf.mxu1  ;;  %3469 = vperm.xlu1 %4390, %v3451_v53  }
 0x141   :  { %v2690_v20 = vpop.f32.mrf.mxu0  ;;  %3107 = vmatmul.mubr.bf16.gmra.mxu0 %v3863_v8  ;;  %v1254_v19 = vld [vmem:[%s5885_s1 + $0x3b0] sm:$0xff] }
 0x142   :  { %v2883_v21 = vpop.f32.mrf.mxu1  ;;  %3300 = vmatmul.mubr.bf16.gmra.mxu1 %v3865_v54  ;;  %3114 = vmatprep.mubr.bf16.mxu0 %v3872_v14 }
 0x143   :  { %v5667_v23 = vadd.f32 %v2883_v21, %v2690_v20  ;;  %v2692_v9 = vpop.f32.mrf.mxu0  ;;  %3307 = vmatprep.mubr.bf16.mxu1 %v3874_v17  ;;  %v1250_v17 = vld [vmem:[%s5885_s1 + $0x390] sm:$0xff]  ;;  %v1251_v21 = vld [vmem:[%s5885_s1 + $0x398] sm:$0xff] }
 0x144   :  { %v2885_v27 = vpop.f32.mrf.mxu1  ;;  %v3896_v28 = vcombine.high %v1250_v17, %v1254_v19 }
 0x145   :  { %v2693_v30 = vpop.f32.mrf.mxu0  ;;  %v3889_v27 = vcombine.low %v1243_v57, %v1247_v58 }
 0x146   :  { %v2886_v25 = vpop.f32.mrf.mxu1 }
 0x147   :  { %v5690_v11 = vadd.f32 %v2886_v25, %v2693_v30  ;;  %v2695_v38 = vpop.f32.mrf.mxu0  ;;  %v3898_v30 = vcombine.high %v1251_v21, %v1255_v22 }
 0x148   :  { %v2888_v39 = vpop.f32.mrf.mxu1  ;;  %v1262_v38 = vld [vmem:[%s5885_s1 + $0x3f0] sm:$0xff] }
 0x149   :  { %v2698_v43 = vpop.f32.mrf.mxu0  ;;  %3115 = vmatmul.mubr.bf16.gmra.mxu0 %v3871_v32  ;;  %v1259_v39 = vld [vmem:[%s5885_s1 + $0x3d8] sm:$0xff]  ;;  %v3904_v49 = vcombine.high %v1258_v37, %v1262_v38  ;;  %v3903_v53 = vcombine.low %v1258_v37, %v1262_v38 }
 0x14a   :  { %v2891_v44 = vpop.f32.mrf.mxu1  ;;  %3308 = vmatmul.mubr.bf16.gmra.mxu1 %v3873_v33  ;;  %3122 = vmatprep.mubr.bf16.mxu0 %v3880_v35  ;;  %v3906_v57 = vcombine.high %v1259_v39, %v1263_v42 }
 0x14b   :  { %v5698_v47 = vadd.f32 %v2891_v44, %v2698_v43  ;;  %v2700_v48 = vpop.f32.mrf.mxu0  ;;  %3315 = vmatprep.mubr.bf16.mxu1 %v3882_v41  ;;  %v3895_v44 = vcombine.low %v1250_v17, %v1254_v19 }
 0x14c   :  { %v2893_v55 = vpop.f32.mrf.mxu1  ;;  %v3897_v48 = vcombine.low %v1251_v21, %v1255_v22 }
 0x14d   :  { %v2701_v51 = vpop.f32.mrf.mxu0 }
 0x14e   :  { %v2894_v5 = vpop.f32.mrf.mxu1 }
 0x14f   :  { %v5715_v7 = vadd.f32 %v2894_v5, %v2701_v51  ;;  %v2703_v4 = vpop.f32.mrf.mxu0 }
 0x150   :  { %v2896_v8 = vpop.f32.mrf.mxu1  ;;  %v1267_v4 = vld [vmem:[%s5885_s1 + $0x418] sm:$0xff] }
 0x151   :  { %v2706_v54 = vpop.f32.mrf.mxu0  ;;  %3123 = vmatmul.mubr.bf16.gmra.mxu0 %v3879_v59 }
 0x152   :  { %v2899_v14 = vpop.f32.mrf.mxu1  ;;  %3316 = vmatmul.mubr.bf16.gmra.mxu1 %v3881_v6  ;;  %3130 = vmatprep.mubr.bf16.mxu0 %v3888_v63  ;;  %v1266_v6 = vld [vmem:[%s5885_s1 + $0x410] sm:$0xff] }
 0x153   :  { %v5720_v3 = vadd.f32 %v2899_v14, %v2706_v54  ;;  %v2708_v16 = vpop.f32.mrf.mxu0  ;;  %3323 = vmatprep.mubr.bf16.mxu1 %v3890_v13  ;;  %v1270_v63 = vld [vmem:[%s5885_s1 + $0x430] sm:$0xff]  ;;  %v1271_v13 = vld [vmem:[%s5885_s1 + $0x438] sm:$0xff]  ;;  %v3905_v14 = vcombine.low %v1259_v39, %v1263_v42 }
 0x154   :  { %v2901_v20 = vpop.f32.mrf.mxu1  ;;  %v3912_v16 = vcombine.high %v1266_v6, %v1270_v63  ;;  %v3913_v37 = vcombine.low %v1267_v4, %v1271_v13 }
 0x155   :  { %v2709_v9 = vpop.f32.mrf.mxu0  ;;  %v3914_v20 = vcombine.high %v1267_v4, %v1271_v13 }
 0x156   :  { %v2902_v10 = vpop.f32.mrf.mxu1 }
 0x157   :  { %v5734_v29 = vadd.f32 %v2902_v10, %v2709_v9  ;;  %v2711_v1 = vpop.f32.mrf.mxu0 }
 0x158   :  { %v2904_v32 = vpop.f32.mrf.mxu1 }
 0x159   :  { %v2714_v25 = vpop.f32.mrf.mxu0  ;;  %3131 = vmatmul.mubr.bf16.gmra.mxu0 %v3887_v26  ;;  %v1279_v32 = vld [vmem:[%s5885_s1 + $0x478] sm:$0xff] }
 0x15a   :  { %v2907_v33 = vpop.f32.mrf.mxu1  ;;  %3324 = vmatmul.mubr.bf16.gmra.mxu1 %v3889_v27  ;;  %3138 = vmatprep.mubr.bf16.mxu0 %v3896_v28  ;;  %v1274_v27 = vld [vmem:[%s5885_s1 + $0x450] sm:$0xff] }
 0x15b   :  { %v5736_v35 = vadd.f32 %v2907_v33, %v2714_v25  ;;  %v2716_v36 = vpop.f32.mrf.mxu0  ;;  %3331 = vmatprep.mubr.bf16.mxu1 %v3898_v30  ;;  %v1278_v28 = vld [vmem:[%s5885_s1 + $0x470] sm:$0xff]  ;;  %v1275_v30 = vld [vmem:[%s5885_s1 + $0x458] sm:$0xff]  ;;  %v3911_v33 = vcombine.low %v1266_v6, %v1270_v63 }
 0x15c   :  { %v2909_v41 = vpop.f32.mrf.mxu1  ;;  %v3920_v38 = vcombine.high %v1274_v27, %v1278_v28  ;;  %v3922_v42 = vcombine.high %v1275_v30, %v1279_v32  ;;  %v3919_v6 = vcombine.low %v1274_v27, %v1278_v28  ;;  %v1295_v27 = vld [vmem:[%s5885_s1 + $0x4f8] sm:$0xff] }
 0x15d   :  { %v2717_v43 = vpop.f32.mrf.mxu0 }
 0x15e   :  { %v2910_v45 = vpop.f32.mrf.mxu1 }
 0x15f   :  { %v5750_v52 = vadd.f32 %v2910_v45, %v2717_v43  ;;  %v2719_v55 = vpop.f32.mrf.mxu0 }
 0x160   :  { %v2912_v58 = vpop.f32.mrf.mxu1  ;;  %v1282_v55 = vld [vmem:[%s5885_s1 + $0x490] sm:$0xff] }
 0x161   :  { %v2722_v50 = vpop.f32.mrf.mxu0  ;;  %3139 = vmatmul.mubr.bf16.gmra.mxu0 %v3895_v44 }
 0x162   :  { %v2915_v51 = vpop.f32.mrf.mxu1  ;;  %3332 = vmatmul.mubr.bf16.gmra.mxu1 %v3897_v48  ;;  %3146 = vmatprep.mubr.bf16.mxu0 %v3904_v49 }
 0x163   :  { %v5752_v59 = vadd.f32 %v2915_v51, %v2722_v50  ;;  %v2724_v5 = vpop.f32.mrf.mxu0  ;;  %3339 = vmatprep.mubr.bf16.mxu1 %v3906_v57  ;;  %v1286_v57 = vld [vmem:[%s5885_s1 + $0x4b0] sm:$0xff]  ;;  %v1283_v50 = vld [vmem:[%s5885_s1 + $0x498] sm:$0xff] }
 0x164   :  { %v2917_v0 = vpop.f32.mrf.mxu1  ;;  %v1287_v51 = vld [vmem:[%s5885_s1 + $0x4b8] sm:$0xff]  ;;  %v3928_v4 = vcombine.high %v1282_v55, %v1286_v57 }
 0x165   :  { %v2725_v8 = vpop.f32.mrf.mxu0  ;;  %v3921_v0 = vcombine.low %v1275_v30, %v1279_v32  ;;  %v3929_v32 = vcombine.low %v1283_v50, %v1287_v51 }
 0x166   :  { %v2918_v54 = vpop.f32.mrf.mxu1 }
 0x167   :  { %v5766_v17 = vadd.f32 %v2918_v54, %v2725_v8  ;;  %v2727_v19 = vpop.f32.mrf.mxu0 }
 0x168   :  { %v2920_v21 = vpop.f32.mrf.mxu1 }
 0x169   :  { %v2730_v22 = vpop.f32.mrf.mxu0  ;;  %3147 = vmatmul.mubr.bf16.gmra.mxu0 %v3903_v53  ;;  %v3930_v53 = vcombine.high %v1283_v50, %v1287_v51  ;;  %v1290_v21 = vld [vmem:[%s5885_s1 + $0x4d0] sm:$0xff] }
 0x16a   :  { %v2923_v9 = vpop.f32.mrf.mxu1  ;;  %3340 = vmatmul.mubr.bf16.gmra.mxu1 %v3905_v14  ;;  %3154 = vmatprep.mubr.bf16.mxu0 %v3912_v16 }
 0x16b   :  { %v5768_v26 = vadd.f32 %v2923_v9, %v2730_v22  ;;  %v2732_v10 = vpop.f32.mrf.mxu0  ;;  %3347 = vmatprep.mubr.bf16.mxu1 %v3914_v20  ;;  %v1294_v22 = vld [vmem:[%s5885_s1 + $0x4f0] sm:$0xff] }
 0x16c   :  { %v2925_v1 = vpop.f32.mrf.mxu1  ;;  %v1291_v10 = vld [vmem:[%s5885_s1 + $0x4d8] sm:$0xff] }
 0x16d   :  { %v2733_v25 = vpop.f32.mrf.mxu0  ;;  %v3927_v1 = vcombine.low %v1282_v55, %v1286_v57  ;;  %v3935_v55 = vcombine.low %v1290_v21, %v1294_v22 }
 0x16e   :  { %v2926_v36 = vpop.f32.mrf.mxu1 }
 0x16f   :  { %v5782_v41 = vadd.f32 %v2926_v36, %v2733_v25  ;;  %v2735_v39 = vpop.f32.mrf.mxu0  ;;  %v3936_v25 = vcombine.high %v1290_v21, %v1294_v22 }
 0x170   :  { %v2928_v43 = vpop.f32.mrf.mxu1 }
 0x171   :  { %v2738_v44 = vpop.f32.mrf.mxu0  ;;  %3155 = vmatmul.mubr.bf16.gmra.mxu0 %v3911_v33 }
 0x172   :  { %v2931_v45 = vpop.f32.mrf.mxu1  ;;  %3348 = vmatmul.mubr.bf16.gmra.mxu1 %v3913_v37  ;;  %3162 = vmatprep.mubr.bf16.mxu0 %v3920_v38  ;;  %v3938_v37 = vcombine.high %v1291_v10, %v1295_v27 }
 0x173   :  { %v5784_v48 = vadd.f32 %v2931_v45, %v2738_v44  ;;  %v2740_v49 = vpop.f32.mrf.mxu0  ;;  %3355 = vmatprep.mubr.bf16.mxu1 %v3922_v42 }
 0x174   :  { %v2933_v58 = vpop.f32.mrf.mxu1 }
 0x175   :  { %v2741_v5 = vpop.f32.mrf.mxu0  ;;  %v3937_v58 = vcombine.low %v1291_v10, %v1295_v27 }
 0x176   :  { %v2934_v63 = vpop.f32.mrf.mxu1 }
 0x177   :  { %v5798_v13 = vadd.f32 %v2934_v63, %v2741_v5  ;;  %v2743_v8 = vpop.f32.mrf.mxu0 }
 0x178   :  { %v2936_v54 = vpop.f32.mrf.mxu1 }
 0x179   :  { %v2746_v14 = vpop.f32.mrf.mxu0  ;;  %3163 = vmatmul.mubr.bf16.gmra.mxu0 %v3919_v6 }
 0x17a   :  { %v2939_v16 = vpop.f32.mrf.mxu1  ;;  %3356 = vmatmul.mubr.bf16.gmra.mxu1 %v3921_v0  ;;  %3170 = vmatprep.mubr.bf16.mxu0 %v3928_v4 }
 0x17b   :  { %v5800_v19 = vadd.f32 %v2939_v16, %v2746_v14  ;;  %v2748_v20 = vpop.f32.mrf.mxu0  ;;  %3363 = vmatprep.mubr.bf16.mxu1 %v3930_v53 }
 0x17c   :  { %v2941_v9 = vpop.f32.mrf.mxu1 }
 0x17d   :  { %v2749_v28 = vpop.f32.mrf.mxu0 }
 0x17e   :  { %v2942_v30 = vpop.f32.mrf.mxu1 }
 0x17f   :  { %v5814_v33 = vadd.f32 %v2942_v30, %v2749_v28  ;;  %v2751_v36 = vpop.f32.mrf.mxu0 }
 0x180   :  { %v2944_v38 = vpop.f32.mrf.mxu1 }
 0x181   :  { %v2754_v39 = vpop.f32.mrf.mxu0  ;;  %3171 = vmatmul.mubr.bf16.gmra.mxu0 %v3927_v1 }
 0x182   :  { %v2947_v42 = vpop.f32.mrf.mxu1  ;;  %3364 = vmatmul.mubr.bf16.gmra.mxu1 %v3929_v32  ;;  %3178 = vmatprep.mubr.bf16.mxu0 %v3936_v25 }
 0x183   :  { %v5816_v43 = vadd.f32 %v2947_v42, %v2754_v39  ;;  %v2756_v44 = vpop.f32.mrf.mxu0  ;;  %3371 = vmatprep.mubr.bf16.mxu1 %v3938_v37 }
 0x184   :  { %v2949_v45 = vpop.f32.mrf.mxu1 }
 0x185   :  { %v2757_v49 = vpop.f32.mrf.mxu0 }
 0x186   :  { %v2950_v57 = vpop.f32.mrf.mxu1 }
 0x187   :  { %v5818_v50 = vadd.f32 %v2950_v57, %v2757_v49  ;;  %v2759_v51 = vpop.f32.mrf.mxu0 }
 0x188   :  { %v2952_v5 = vpop.f32.mrf.mxu1 }
 0x189   :  { %v2762_v6 = vpop.f32.mrf.mxu0  ;;  %3179 = vmatmul.mubr.bf16.gmra.mxu0 %v3935_v55 }
 0x18a   :  { %v2955_v63 = vpop.f32.mrf.mxu1  ;;  %3372 = vmatmul.mubr.bf16.gmra.mxu1 %v3937_v58 }
 0x18b   :  { %v5820_v0 = vadd.f32 %v2955_v63, %v2762_v6  ;;  %v2764_v4 = vpop.f32.mrf.mxu0 }
 0x18c   :  { %v2957_v8 = vpop.f32.mrf.mxu1 }
 0x18d   :  { %v2765_v53 = vpop.f32.mrf.mxu0 }
 0x18e   :  { %v2958_v54 = vpop.f32.mrf.mxu1 }
 0x18f   :  { %v5822_v14 = vadd.f32 %v2958_v54, %v2765_v53  ;;  %v2767_v16 = vpop.f32.mrf.mxu0 }
 0x190   :  { %v2960_v20 = vpop.f32.mrf.mxu1 }
 0x191   :  { %v2770_v21 = vpop.f32.mrf.mxu0 }
 0x192   :  { %v2963_v22 = vpop.f32.mrf.mxu1 }
 0x193   :  { %v5824_v9 = vadd.f32 %v2963_v22, %v2770_v21  ;;  %v2772_v10 = vpop.f32.mrf.mxu0 }
 0x194   :  { %v2965_v27 = vpop.f32.mrf.mxu1 }
 0x195   :  { %v2773_v28 = vpop.f32.mrf.mxu0 }
 0x196   :  { %v2966_v1 = vpop.f32.mrf.mxu1 }
 0x197   :  { %v5826_v30 = vadd.f32 %v2966_v1, %v2773_v28  ;;  %v2775_v32 = vpop.f32.mrf.mxu0 }
 0x198   :  { %v2968_v25 = vpop.f32.mrf.mxu1 }
 0x199   :  { %v2778_v36 = vpop.f32.mrf.mxu0 }
 0x19a   :  { %v2971_v37 = vpop.f32.mrf.mxu1 }
 0x19b   :  { %v5828_v38 = vadd.f32 %v2971_v37, %v2778_v36  ;;  %v2780_v39 = vpop.f32.mrf.mxu0 }
 0x19c   :  { %v2973_v42 = vpop.f32.mrf.mxu1 }
 0x19d   :  { %v2781_v44 = vpop.f32.mrf.mxu0 }
 0x19e   :  { %v2974_v45 = vpop.f32.mrf.mxu1 }
 0x19f   :  { %v5830_v49 = vadd.f32 %v2974_v45, %v2781_v44  ;;  %v2783_v55 = vpop.f32.mrf.mxu0 }
 0x1a0   :  { %v2976_v57 = vpop.f32.mrf.mxu1 }
 0x1a1   :  { %v2786_v58 = vpop.f32.mrf.mxu0 }
 0x1a2   :  { %v2979_v51 = vpop.f32.mrf.mxu1 }
 0x1a3   :  { %v5832_v5 = vadd.f32 %v2979_v51, %v2786_v58  ;;  %v2788_v6 = vpop.f32.mrf.mxu0 }
 0x1a4   :  { %v2981_v63 = vpop.f32.mrf.mxu1 }
 0x1a5   :  { %v2789_v4 = vpop.f32.mrf.mxu0 }
 0x1a6   :  { %v2982_v8 = vpop.f32.mrf.mxu1 }
 0x1a7   :  { %v5834_v53 = vadd.f32 %v2982_v8, %v2789_v4  ;;  %v2791_v54 = vpop.f32.mrf.mxu0 }
 0x1a8   :  { %v2984_v16 = vpop.f32.mrf.mxu1 }
 0x1a9   :  { %v2794_v20 = vpop.f32.mrf.mxu0 }
 0x1aa   :  { %v2987_v21 = vpop.f32.mrf.mxu1 }
 0x1ab   :  { %v5836_v22 = vadd.f32 %v2987_v21, %v2794_v20  ;;  %v2796_v10 = vpop.f32.mrf.mxu0 }
 0x1ac   :  { %v2989_v27 = vpop.f32.mrf.mxu1 }
 0x1ad   :  { %v2797_v28 = vpop.f32.mrf.mxu0 }
 0x1ae   :  { %v2990_v1 = vpop.f32.mrf.mxu1 }
 0x1af   :  { %v5838_v32 = vadd.f32 %v2990_v1, %v2797_v28  ;;  %v2799_v25 = vpop.f32.mrf.mxu0 }
 0x1b0   :  { %v2992_v36 = vpop.f32.mrf.mxu1 }
 0x1b1   :  { %v3028_v37 = vpop.f32.mrf.mxu0 }
 0x1b2   :  { %v3029_v39 = vadd.f32 %v3028_v37, %v5565_v31  ;;  %v3221_v42 = vpop.f32.mrf.mxu1 }
 0x1b3   :  { %v3030_v44 = vpop.f32.mrf.mxu0 }
 0x1b4   :  { %v3222_v45 = vadd.f32 %v3221_v42, %v3029_v39  ;;  %v3223_v55 = vpop.f32.mrf.mxu1 }
 0x1b5   :  { %v3031_v57 = vpop.f32.mrf.mxu0 }
 0x1b6   :  { %v3032_v58 = vadd.f32 %v3031_v57, %v5579_v12  ;;  %v3224_v51 = vpop.f32.mrf.mxu1 }
 0x1b7   :  { %v3033_v6 = vpop.f32.mrf.mxu0 }
 0x1b8   :  { %v3225_v63 = vadd.f32 %v3224_v51, %v3032_v58  ;;  %v3226_v4 = vpop.f32.mrf.mxu1 }
 0x1b9   :  { %v3036_v8 = vpop.f32.mrf.mxu0 }
 0x1ba   :  { %v3037_v54 = vadd.f32 %v3036_v8, %v5581_v46  ;;  %v3229_v16 = vpop.f32.mrf.mxu1 }
 0x1bb   :  { %v3038_v20 = vpop.f32.mrf.mxu0 }
 0x1bc   :  { %v3230_v21 = vadd.f32 %v3229_v16, %v3037_v54  ;;  %v3231_v10 = vpop.f32.mrf.mxu1 }
 0x1bd   :  { %v3039_v27 = vpop.f32.mrf.mxu0 }
 0x1be   :  { %v3040_v31 = vadd.f32 %v3039_v27, %v5595_v61  ;;  %v3232_v28 = vpop.f32.mrf.mxu1 }
 0x1bf   :  { %v3041_v1 = vpop.f32.mrf.mxu0 }
 0x1c0   :  { %v3233_v25 = vadd.f32 %v3232_v28, %v3040_v31  ;;  %v3234_v36 = vpop.f32.mrf.mxu1 }
 0x1c1   :  { %v3044_v37 = vpop.f32.mrf.mxu0 }
 0x1c2   :  { %v3045_v12 = vadd.f32 %v3044_v37, %v5597_v60  ;;  %v3237_v39 = vpop.f32.mrf.mxu1 }
 0x1c3   :  { %v3046_v42 = vpop.f32.mrf.mxu0 }
 0x1c4   :  { %v3238_v44 = vadd.f32 %v3237_v39, %v3045_v12  ;;  %v3239_v55 = vpop.f32.mrf.mxu1 }
 0x1c5   :  { %v3047_v57 = vpop.f32.mrf.mxu0 }
 0x1c6   :  { %v3380_v46 = vmax.f32 %v3222_v45, %v3238_v44  ;;  %v3048_v58 = vadd.f32 %v3047_v57, %v5611_v18  ;;  %v3240_v51 = vpop.f32.mrf.mxu1 }
 0x1c7   :  { %v3049_v6 = vpop.f32.mrf.mxu0 }
 0x1c8   :  { %v3241_v4 = vadd.f32 %v3240_v51, %v3048_v58  ;;  %v3242_v8 = vpop.f32.mrf.mxu1 }
 0x1c9   :  { %v3052_v61 = vpop.f32.mrf.mxu0 }
 0x1ca   :  { %v3381_v54 = vmax.f32 %v3225_v63, %v3241_v4  ;;  %v3053_v16 = vadd.f32 %v3052_v61, %v5613_v24  ;;  %v3245_v20 = vpop.f32.mrf.mxu1 }
 0x1cb   :  { %v3054_v10 = vpop.f32.mrf.mxu0 }
 0x1cc   :  { %v3246_v27 = vadd.f32 %v3245_v20, %v3053_v16  ;;  %v3247_v60 = vpop.f32.mrf.mxu1 }
 0x1cd   :  { %v3055_v31 = vpop.f32.mrf.mxu0 }
 0x1ce   :  { %v3382_v28 = vmax.f32 %v3230_v21, %v3246_v27  ;;  %v3056_v1 = vadd.f32 %v3055_v31, %v5627_v34  ;;  %v3248_v36 = vpop.f32.mrf.mxu1 }
 0x1cf   :  { %v3057_v45 = vpop.f32.mrf.mxu0 }
 0x1d0   :  { %v3249_v37 = vadd.f32 %v3248_v36, %v3056_v1  ;;  %v3250_v18 = vpop.f32.mrf.mxu1 }
 0x1d1   :  { %v3060_v12 = vpop.f32.mrf.mxu0 }
 0x1d2   :  { %v3383_v39 = vmax.f32 %v3233_v25, %v3249_v37  ;;  %v3061_v42 = vadd.f32 %v3060_v12, %v5629_v40  ;;  %v3253_v44 = vpop.f32.mrf.mxu1 }
 0x1d3   :  { %v3062_v63 = vpop.f32.mrf.mxu0 }
 0x1d4   :  { %v3254_v55 = vadd.f32 %v3253_v44, %v3061_v42  ;;  %v3255_v24 = vpop.f32.mrf.mxu1 }
 0x1d5   :  { %v3063_v57 = vpop.f32.mrf.mxu0 }
 0x1d6   :  { %v3384_v58 = vmax.f32 %v3380_v46, %v3254_v55  ;;  %v3064_v51 = vadd.f32 %v3063_v57, %v5643_v56  ;;  %v3256_v6 = vpop.f32.mrf.mxu1 }
 0x1d7   :  { %v3065_v21 = vpop.f32.mrf.mxu0 }
 0x1d8   :  { %v3257_v4 = vadd.f32 %v3256_v6, %v3064_v51  ;;  %v3258_v34 = vpop.f32.mrf.mxu1 }
 0x1d9   :  { %v3068_v8 = vpop.f32.mrf.mxu0 }
 0x1da   :  { %v3385_v61 = vmax.f32 %v3381_v54, %v3257_v4  ;;  %v3069_v16 = vadd.f32 %v3068_v8, %v5645_v62  ;;  %v3261_v20 = vpop.f32.mrf.mxu1 }
 0x1db   :  { %v3070_v25 = vpop.f32.mrf.mxu0 }
 0x1dc   :  { %v3262_v10 = vadd.f32 %v3261_v20, %v3069_v16  ;;  %v3263_v40 = vpop.f32.mrf.mxu1 }
 0x1dd   :  { %v3071_v27 = vpop.f32.mrf.mxu0 }
 0x1de   :  { %v3386_v60 = vmax.f32 %v3382_v28, %v3262_v10  ;;  %v3072_v31 = vadd.f32 %v3071_v27, %v5662_v15  ;;  %v3264_v1 = vpop.f32.mrf.mxu1 }
 0x1df   :  { %v3073_v46 = vpop.f32.mrf.mxu0 }
 0x1e0   :  { %v3265_v36 = vadd.f32 %v3264_v1, %v3072_v31  ;;  %v3266_v56 = vpop.f32.mrf.mxu1 }
 0x1e1   :  { %v3076_v45 = vpop.f32.mrf.mxu0 }
 0x1e2   :  { %v3387_v37 = vmax.f32 %v3383_v39, %v3265_v36  ;;  %v3077_v18 = vadd.f32 %v3076_v45, %v5667_v23  ;;  %v3269_v12 = vpop.f32.mrf.mxu1 }
 0x1e3   :  { %v3078_v54 = vpop.f32.mrf.mxu0 }
 0x1e4   :  { %v3270_v42 = vadd.f32 %v3269_v12, %v3077_v18  ;;  %v3271_v62 = vpop.f32.mrf.mxu1 }
 0x1e5   :  { %v3079_v44 = vpop.f32.mrf.mxu0 }
 0x1e6   :  { %v3388_v63 = vmax.f32 %v3384_v58, %v3270_v42  ;;  %v3080_v55 = vadd.f32 %v3079_v44, %v5690_v11  ;;  %v3272_v24 = vpop.f32.mrf.mxu1 }
 0x1e7   :  { %v3081_v28 = vpop.f32.mrf.mxu0 }
 0x1e8   :  { %v3273_v57 = vadd.f32 %v3272_v24, %v3080_v55  ;;  %v3274_v15 = vpop.f32.mrf.mxu1 }
 0x1e9   :  { %v3084_v51 = vpop.f32.mrf.mxu0 }
 0x1ea   :  { %v3389_v6 = vmax.f32 %v3385_v61, %v3273_v57  ;;  %v3085_v21 = vadd.f32 %v3084_v51, %v5698_v47  ;;  %v3277_v4 = vpop.f32.mrf.mxu1 }
 0x1eb   :  { %v3086_v39 = vpop.f32.mrf.mxu0 }
 0x1ec   :  { %v3278_v34 = vadd.f32 %v3277_v4, %v3085_v21  ;;  %v3279_v23 = vpop.f32.mrf.mxu1 }
 0x1ed   :  { %v3087_v8 = vpop.f32.mrf.mxu0 }
 0x1ee   :  { %v3390_v16 = vmax.f32 %v3386_v60, %v3278_v34  ;;  %v3088_v20 = vadd.f32 %v3087_v8, %v5715_v7  ;;  %v3280_v25 = vpop.f32.mrf.mxu1 }
 0x1ef   :  { %v3089_v58 = vpop.f32.mrf.mxu0 }
 0x1f0   :  { %v3281_v10 = vadd.f32 %v3280_v25, %v3088_v20  ;;  %v3282_v11 = vpop.f32.mrf.mxu1 }
 0x1f1   :  { %v3092_v40 = vpop.f32.mrf.mxu0 }
 0x1f2   :  { %v3391_v27 = vmax.f32 %v3387_v37, %v3281_v10  ;;  %v3093_v31 = vadd.f32 %v3092_v40, %v5720_v3  ;;  %v3285_v1 = vpop.f32.mrf.mxu1 }
 0x1f3   :  { %v3094_v61 = vpop.f32.mrf.mxu0 }
 0x1f4   :  { %v3286_v46 = vadd.f32 %v3285_v1, %v3093_v31  ;;  %v3287_v47 = vpop.f32.mrf.mxu1 }
 0x1f5   :  { %v3095_v36 = vpop.f32.mrf.mxu0 }
 0x1f6   :  { %v3392_v56 = vmax.f32 %v3388_v63, %v3286_v46  ;;  %v3096_v45 = vadd.f32 %v3095_v36, %v5734_v29  ;;  %v3288_v18 = vpop.f32.mrf.mxu1 }
 0x1f7   :  { %v3097_v60 = vpop.f32.mrf.mxu0 }
 0x1f8   :  { %v3289_v12 = vadd.f32 %v3288_v18, %v3096_v45  ;;  %v3290_v7 = vpop.f32.mrf.mxu1 }
 0x1f9   :  { %v3100_v54 = vpop.f32.mrf.mxu0 }
 0x1fa   :  { %v3393_v42 = vmax.f32 %v3389_v6, %v3289_v12  ;;  %v3101_v62 = vadd.f32 %v3100_v54, %v5736_v35  ;;  %v3293_v44 = vpop.f32.mrf.mxu1 }
 0x1fb   :  { %v3102_v37 = vpop.f32.mrf.mxu0 }
 0x1fc   :  { %v3294_v55 = vadd.f32 %v3293_v44, %v3101_v62  ;;  %v3295_v3 = vpop.f32.mrf.mxu1 }
 0x1fd   :  { %v3103_v24 = vpop.f32.mrf.mxu0 }
 0x1fe   :  { %v3394_v28 = vmax.f32 %v3390_v16, %v3294_v55  ;;  %v3104_v57 = vadd.f32 %v3103_v24, %v5750_v52  ;;  %v3296_v15 = vpop.f32.mrf.mxu1 }
 0x1ff   :  { %v3105_v63 = vpop.f32.mrf.mxu0 }
 0x200   :  { %v3297_v51 = vadd.f32 %v3296_v15, %v3104_v57  ;;  %v3298_v29 = vpop.f32.mrf.mxu1 }
 0x201   :  { %v3108_v21 = vpop.f32.mrf.mxu0 }
 0x202   :  { %v3395_v4 = vmax.f32 %v3391_v27, %v3297_v51  ;;  %v3109_v39 = vadd.f32 %v3108_v21, %v5752_v59  ;;  %v3301_v34 = vpop.f32.mrf.mxu1 }
 0x203   :  { %v3110_v6 = vpop.f32.mrf.mxu0 }
 0x204   :  { %v3302_v23 = vadd.f32 %v3301_v34, %v3109_v39  ;;  %v3303_v35 = vpop.f32.mrf.mxu1 }
 0x205   :  { %v3111_v8 = vpop.f32.mrf.mxu0 }
 0x206   :  { %v3396_v20 = vmax.f32 %v3392_v56, %v3302_v23  ;;  %v3112_v25 = vadd.f32 %v3111_v8, %v5766_v17  ;;  %v3304_v58 = vpop.f32.mrf.mxu1 }
 0x207   :  { %v3113_v16 = vpop.f32.mrf.mxu0 }
 0x208   :  { %v3305_v10 = vadd.f32 %v3304_v58, %v3112_v25  ;;  %v3306_v52 = vpop.f32.mrf.mxu1 }
 0x209   :  { %v3116_v11 = vpop.f32.mrf.mxu0 }
 0x20a   :  { %v3397_v40 = vmax.f32 %v3393_v42, %v3305_v10  ;;  %v3117_v31 = vadd.f32 %v3116_v11, %v5768_v26  ;;  %v3309_v1 = vpop.f32.mrf.mxu1 }
 0x20b   :  { %v3118_v27 = vpop.f32.mrf.mxu0 }
 0x20c   :  { %v3310_v61 = vadd.f32 %v3309_v1, %v3117_v31  ;;  %v3311_v59 = vpop.f32.mrf.mxu1 }
 0x20d   :  { %v3119_v46 = vpop.f32.mrf.mxu0 }
 0x20e   :  { %v3398_v47 = vmax.f32 %v3394_v28, %v3310_v61  ;;  %v3120_v36 = vadd.f32 %v3119_v46, %v5782_v41  ;;  %v3312_v45 = vpop.f32.mrf.mxu1 }
 0x20f   :  { %v3121_v56 = vpop.f32.mrf.mxu0 }
 0x210   :  { %v3313_v18 = vadd.f32 %v3312_v45, %v3120_v36  ;;  %v3314_v17 = vpop.f32.mrf.mxu1 }
 0x211   :  { %v3124_v60 = vpop.f32.mrf.mxu0 }
 0x212   :  { %v3399_v12 = vmax.f32 %v3395_v4, %v3313_v18  ;;  %v3125_v7 = vadd.f32 %v3124_v60, %v5784_v48  ;;  %v3317_v54 = vpop.f32.mrf.mxu1 }
 0x213   :  { %v3126_v42 = vpop.f32.mrf.mxu0 }
 0x214   :  { %v3318_v62 = vadd.f32 %v3317_v54, %v3125_v7  ;;  %v3319_v26 = vpop.f32.mrf.mxu1 }
 0x215   :  { %v3127_v44 = vpop.f32.mrf.mxu0 }
 0x216   :  { %v3400_v37 = vmax.f32 %v3396_v20, %v3318_v62  ;;  %v3128_v55 = vadd.f32 %v3127_v44, %v5798_v13  ;;  %v3320_v3 = vpop.f32.mrf.mxu1 }
 0x217   :  { %v3129_v24 = vpop.f32.mrf.mxu0 }
 0x218   :  { %v3321_v28 = vadd.f32 %v3320_v3, %v3128_v55  ;;  %v3322_v41 = vpop.f32.mrf.mxu1 }
 0x219   :  { %v3132_v57 = vpop.f32.mrf.mxu0 }
 0x21a   :  { %v3401_v15 = vmax.f32 %v3397_v40, %v3321_v28  ;;  %v3133_v63 = vadd.f32 %v3132_v57, %v5800_v19  ;;  %v3325_v51 = vpop.f32.mrf.mxu1 }
 0x21b   :  { %v3134_v29 = vpop.f32.mrf.mxu0 }
 0x21c   :  { %v3326_v21 = vadd.f32 %v3325_v51, %v3133_v63  ;;  %v3327_v48 = vpop.f32.mrf.mxu1 }
 0x21d   :  { %v3135_v4 = vpop.f32.mrf.mxu0 }
 0x21e   :  { %v3402_v39 = vmax.f32 %v3398_v47, %v3326_v21  ;;  %v3136_v34 = vadd.f32 %v3135_v4, %v5814_v33  ;;  %v3328_v6 = vpop.f32.mrf.mxu1 }
 0x21f   :  { %v3137_v23 = vpop.f32.mrf.mxu0 }
 0x220   :  { %v3329_v35 = vadd.f32 %v3328_v6, %v3136_v34  ;;  %v3330_v13 = vpop.f32.mrf.mxu1 }
 0x221   :  { %v3140_v8 = vpop.f32.mrf.mxu0  ;;  %v3423_v13 = vpop.permute.xlu0 %3422 }
 0x222   :  { %v3403_v20 = vmax.f32 %v3399_v12, %v3329_v35  ;;  %v3141_v25 = vadd.f32 %v3140_v8, %v5816_v43  ;;  %v3333_v58 = vpop.f32.mrf.mxu1 }
 0x223   :  { %v3142_v16 = vpop.f32.mrf.mxu0 }
 0x224   :  { %v3334_v10 = vadd.f32 %v3333_v58, %v3141_v25  ;;  %v3335_v19 = vpop.f32.mrf.mxu1  ;;  %v3433_v16 = vpop.permute.xlu1 %3432 }
 0x225   :  { %v3143_v52 = vpop.f32.mrf.mxu0 }
 0x226   :  { %v3404_v11 = vmax.f32 %v3400_v37, %v3334_v10  ;;  %v3144_v40 = vadd.f32 %v3143_v52, %v5818_v50  ;;  %v3336_v31 = vpop.f32.mrf.mxu1 }
 0x227   :  { %v3145_v1 = vpop.f32.mrf.mxu0 }
 0x228   :  { %v3337_v27 = vadd.f32 %v3336_v31, %v3144_v40  ;;  %v3338_v33 = vpop.f32.mrf.mxu1 }
 0x229   :  { %v3148_v61 = vpop.f32.mrf.mxu0 }
 0x22a   :  { %v3405_v59 = vmax.f32 %v3401_v15, %v3337_v27  ;;  %v3149_v46 = vadd.f32 %v3148_v61, %v5820_v0  ;;  %v3341_v47 = vpop.f32.mrf.mxu1 }
 0x22b   :  { %v3150_v36 = vpop.f32.mrf.mxu0 }
 0x22c   :  { %v3342_v45 = vadd.f32 %v3341_v47, %v3149_v46  ;;  %v3343_v43 = vpop.f32.mrf.mxu1 }
 0x22d   :  { %v3151_v56 = vpop.f32.mrf.mxu0 }
 0x22e   :  { %v3406_v18 = vmax.f32 %v3402_v39, %v3342_v45  ;;  %v3152_v17 = vadd.f32 %v3151_v56, %v5822_v14  ;;  %v3344_v60 = vpop.f32.mrf.mxu1 }
 0x22f   :  { %v3153_v12 = vpop.f32.mrf.mxu0 }
 0x230   :  { %v3345_v7 = vadd.f32 %v3344_v60, %v3152_v17  ;;  %v3346_v50 = vpop.f32.mrf.mxu1 }
 0x231   :  { %v3156_v54 = vpop.f32.mrf.mxu0 }
 0x232   :  { %v3407_v42 = vmax.f32 %v3403_v20, %v3345_v7  ;;  %v3157_v62 = vadd.f32 %v3156_v54, %v5824_v9  ;;  %v3349_v26 = vpop.f32.mrf.mxu1 }
 0x233   :  { %v3158_v44 = vpop.f32.mrf.mxu0 }
 0x234   :  { %v3350_v37 = vadd.f32 %v3349_v26, %v3157_v62  ;;  %v3351_v0 = vpop.f32.mrf.mxu1 }
 0x235   :  { %v3159_v55 = vpop.f32.mrf.mxu0 }
 0x236   :  { %v3408_v3 = vmax.f32 %v3404_v11, %v3350_v37  ;;  %v3160_v24 = vadd.f32 %v3159_v55, %v5826_v30  ;;  %v3352_v28 = vpop.f32.mrf.mxu1 }
 0x237   :  { %v3161_v41 = vpop.f32.mrf.mxu0 }
 0x238   :  { %v3353_v57 = vadd.f32 %v3352_v28, %v3160_v24  ;;  %v3354_v14 = vpop.f32.mrf.mxu1 }
 0x239   :  { %v3164_v15 = vpop.f32.mrf.mxu0 }
 0x23a   :  { %v3409_v63 = vmax.f32 %v3405_v59, %v3353_v57  ;;  %v3165_v51 = vadd.f32 %v3164_v15, %v5828_v38  ;;  %v3357_v29 = vpop.f32.mrf.mxu1  ;;  %v3438_v59 = vpop.permute.xlu1 %3437 }
 0x23b   :  { %v3166_v21 = vpop.f32.mrf.mxu0 }
 0x23c   :  { %v3358_v48 = vadd.f32 %v3357_v29, %v3165_v51  ;;  %v3359_v9 = vpop.f32.mrf.mxu1 }
 0x23d   :  { %v3167_v4 = vpop.f32.mrf.mxu0  ;;  %v3493_v9 = vsub.s32 0, %v4493_v2 }
 0x23e   :  { %v3410_v39 = vmax.f32 %v3406_v18, %v3358_v48  ;;  %v3168_v34 = vadd.f32 %v3167_v4, %v5830_v49  ;;  %v3360_v6 = vpop.f32.mrf.mxu1  ;;  %v3428_v49 = vpop.permute.xlu0 %3427 }
 0x23f   :  { %v3169_v23 = vpop.f32.mrf.mxu0 }
 0x240   :  { %v3361_v35 = vadd.f32 %v3360_v6, %v3168_v34  ;;  %v3362_v30 = vpop.f32.mrf.mxu1 }
 0x241   :  { %v3172_v8 = vpop.f32.mrf.mxu0 }
 0x242   :  { %v3411_v20 = vmax.f32 %v3407_v42, %v3361_v35  ;;  %v3173_v25 = vadd.f32 %v3172_v8, %v5832_v5  ;;  %v3365_v58 = vpop.f32.mrf.mxu1  ;;  %v3455_v60 = vpop.permute.xlu0 %3454 }
 0x243   :  { %v3174_v38 = vpop.f32.mrf.mxu0  ;;  %v3460_v42 = vpop.permute.xlu1 %3459 }
 0x244   :  { %v3366_v10 = vadd.f32 %v3365_v58, %v3173_v25  ;;  %v3367_v19 = vpop.f32.mrf.mxu1 }
 0x245   :  { %v3175_v52 = vpop.f32.mrf.mxu0 }
 0x246   :  { %v3412_v11 = vmax.f32 %v3408_v3, %v3366_v10  ;;  %v3176_v40 = vadd.f32 %v3175_v52, %v5834_v53  ;;  %v3368_v31 = vpop.f32.mrf.mxu1  ;;  %v3465_v28 = vpop.permute.xlu0 %3464 }
 0x247   :  { %v3177_v1 = vpop.f32.mrf.mxu0 }
 0x248   :  { %v3440_v27 = vadd.f32 %v3423_v13, %v3412_v11  ;;  %v3369_v33 = vadd.f32 %v3368_v31, %v3176_v40  ;;  %v3370_v61 = vpop.f32.mrf.mxu1 }
 0x249   :  { %v3180_v46 = vpop.f32.mrf.mxu0 }
 0x24a   :  { %v3413_v47 = vmax.f32 %v3409_v63, %v3369_v33  ;;  %v3181_v5 = vadd.f32 %v3180_v46, %v5836_v22  ;;  %v3373_v36 = vpop.f32.mrf.mxu1  ;;  %v3444_v43 = vmax.f32 %v3440_v27, 0.0  ;;  %v3470_v63 = vpop.permute.xlu1 %3469 }
 0x24b   :  { %v3182_v45 = vpop.f32.mrf.mxu0 }
 0x24c   :  { %v3441_v56 = vadd.f32 %v3428_v49, %v3413_v47  ;;  %v3374_v18 = vadd.f32 %v3373_v36, %v3181_v5  ;;  %v3375_v17 = vpop.f32.mrf.mxu1  ;;  %v3472_v26 = vmul.f32 %v3455_v60, %v3444_v43 }
 0x24d   :  { %v3183_v12 = vpop.f32.mrf.mxu0 }
 0x24e   :  { %v3445_v53 = vmax.f32 %v3441_v56, 0.0  ;;  %v3414_v7 = vmax.f32 %v3410_v39, %v3374_v18  ;;  %v3184_v50 = vadd.f32 %v3183_v12, %v5838_v32  ;;  %v3376_v54 = vpop.f32.mrf.mxu1  ;;  %v3489_v39 = vpop.permute.xlu0 %3488 }
 0x24f   :  { %v3185_v62 = vpop.f32.mrf.mxu0  ;;  %v3494_v6 = vrot.slane %v3489_v39, %v3493_v9 }
 0x250   :  { %v3473_v44 = vmul.f32 %v3460_v42, %v3445_v53  ;;  %v3442_v37 = vadd.f32 %v3433_v16, %v3414_v7  ;;  %v3377_v0 = vadd.f32 %v3376_v54, %v3184_v50  ;;  %v3378_v22 = vpop.f32.mrf.mxu1 }
 0x252   :  { %v3476_v55 = vadd.f32 %v3473_v44, %v3472_v26  ;;  %v3446_v3 = vmax.f32 %v3442_v37, 0.0  ;;  %v3415_v24 = vmax.f32 %v3411_v20, %v3377_v0 }
 0x254   :  { %v3474_v41 = vmul.f32 %v3465_v28, %v3446_v3  ;;  %v3443_v57 = vadd.f32 %v3438_v59, %v3415_v24 }
 0x256   :  { %v3477_v14 = vadd.f32 %v3476_v55, %v3474_v41  ;;  %v3447_v15 = vmax.f32 %v3443_v57, 0.0 }
 0x258   :  { %v3475_v51 = vmul.f32 %v3470_v63, %v3447_v15 }
 0x25a   :  { %v3478_v29 = vadd.f32 %v3477_v14, %v3475_v51 }
 0x25c   :  { %v3479_v32 = vrot.slane %v3478_v29, 4 }
 0x25e   :  { %v3480_v21 = vadd.f32 %v3479_v32, %v3478_v29 }
 0x260   :  { %v3481_v48 = vrot.slane %v3480_v21, 2 }
 0x262   :  { %v3482_v4 = vadd.f32 %v3481_v48, %v3480_v21 }
 0x264   :  { %v3483_v34 = vrot.slane %v3482_v4, 1 }
 0x266   :  { %v3484_v23 = vadd.f32 %v3483_v34, %v3482_v4 }
 0x268   :  { %v3495_v35 = vadd.f32 %v3494_v6, %v3484_v23 }
 0x26a   :  { %v4003_v30 = vmul.f32 -1.442695, %v3495_v35 }
 0x26c   :  { %4455 = vpow2.f32 %v4003_v30 }
 0x279   :  { %v4456_v13 = vpop.eup %4455 }
 0x27a   :  { %v3499_v8 = vadd.f32 1.0, %v4456_v13 }
 0x27c   :  { %4457 = vrcp.f32 %v3499_v8 }
 0x289   :  { %v4458_v20 = vpop.eup %4457 }
 0x28a   :  { %3502 = vst [vmem:[%s5889_s5] sm:$0x1] %v4458_v20 }

</bundles_post_ra>
